<compile_context>
chip_gen: v7x
topology: tpu7x:2x2x1
jax: 0.10.0
libtpu: 0.0.40
codegen_flags: <defaults>
</compile_context>

<pallas_src>
import functools

import jax
import jax.numpy as jnp
from jax.experimental import pallas as pl
from jax.experimental.pallas import tpu as pltpu


# ----------------------------------------------------------------------------
# Packed-parameter slab layout (static, 8-row aligned sections).
# ----------------------------------------------------------------------------
def _round_up(n, m):
    return ((n + m - 1) // m) * m


def _layout(D, H1, H2, U3, U4, O):
    off = {}
    r = 0
    off["rhs"] = r;  r += _round_up(H1 + H2, 8)   # block RHS [[Whh1|Wih2],[0|Whh2]]
    off["wih1"] = r; r += _round_up(D, 8)         # W_ih1 (D, 4H1) in cols 0:4H1
    off["bias"] = r; r += 8                       # row: b1 in 0:4H1, b2 in 4H1:
    off["fc1w"] = r; r += _round_up(H2, 8)        # fc1_w (H2, U3)
    off["fc2w"] = r; r += _round_up(U3, 8)        # fc2_w (U3, U4)
    off["fc3w"] = r; r += _round_up(U4, 8)        # fc3_w (U4, O)
    off["fcb"] = r;  r += 8                       # rows: fc1_b / fc2_b / fc3_b
    off["_rows"] = _round_up(r, 8)
    return off


def pack_params(params):
    D = params["l1_w_ih"].shape[0]
    H1 = params["l1_w_hh"].shape[0]
    H2 = params["l2_w_hh"].shape[0]
    U3 = params["fc1_w"].shape[1]
    U4 = params["fc2_w"].shape[1]
    O = params["fc3_w"].shape[1]
    G1, G2 = 4 * H1, 4 * H2
    off = _layout(D, H1, H2, U3, U4, O)

    slab = jnp.zeros((off["_rows"], G1 + G2), jnp.float32)
    # Wavefront block RHS: [[W_hh1 | W_ih2], [0 | W_hh2]]
    slab = slab.at[off["rhs"]:off["rhs"] + H1, 0:G1].set(params["l1_w_hh"])
    slab = slab.at[off["rhs"]:off["rhs"] + H1, G1:G1 + G2].set(params["l2_w_ih"])
    slab = slab.at[off["rhs"] + H1:off["rhs"] + H1 + H2, G1:G1 + G2].set(params["l2_w_hh"])
    # Layer-1 input projection + combined biases
    slab = slab.at[off["wih1"]:off["wih1"] + D, 0:G1].set(params["l1_w_ih"])
    slab = slab.at[off["bias"], 0:G1].set(params["l1_b"].reshape(-1))
    slab = slab.at[off["bias"], G1:G1 + G2].set(params["l2_b"].reshape(-1))
    # FC head
    slab = slab.at[off["fc1w"]:off["fc1w"] + H2, 0:U3].set(params["fc1_w"])
    slab = slab.at[off["fc2w"]:off["fc2w"] + U3, 0:U4].set(params["fc2_w"])
    slab = slab.at[off["fc3w"]:off["fc3w"] + U4, 0:O].set(params["fc3_w"])
    slab = slab.at[off["fcb"], 0:U3].set(params["fc1_b"].reshape(-1))
    slab = slab.at[off["fcb"] + 1, 0:U4].set(params["fc2_b"].reshape(-1))
    slab = slab.at[off["fcb"] + 2, 0:O].set(params["fc3_b"].reshape(-1))
    return slab, (D, H1, H2, U3, U4, O)


# ----------------------------------------------------------------------------
# Fused kernel: LSTM1 + LSTM2 (wavefront) -> FC head -> softmax
# ----------------------------------------------------------------------------
def _fused_kernel(x_ref, p_ref, out_ref, *, B, T, D, H1, H2, U3, U4, O, off):
    """x_ref: (T*B, D) time-major-flattened input (row t*B + b).
    p_ref: packed parameter slab (see _layout)."""
    f32 = jnp.float32
    G1, G2 = 4 * H1, 4 * H2

    # ---- unpack parameters with static, aligned slices ----------------------
    rhs = p_ref[off["rhs"]:off["rhs"] + H1 + H2, :]              # (H1+H2, G1+G2)
    w_ih1 = p_ref[off["wih1"]:off["wih1"] + D, 0:G1]             # (D, G1)
    b1 = p_ref[off["bias"]:off["bias"] + 1, 0:G1]                # (1, G1)
    b2 = p_ref[off["bias"]:off["bias"] + 1, G1:G1 + G2]          # (1, G2)
    fc1_w = p_ref[off["fc1w"]:off["fc1w"] + H2, 0:U3]
    fc2_w = p_ref[off["fc2w"]:off["fc2w"] + U3, 0:U4]
    fc3_w = p_ref[off["fc3w"]:off["fc3w"] + U4, 0:O]
    fc1_b = p_ref[off["fcb"]:off["fcb"] + 1, 0:U3]
    fc2_b = p_ref[off["fcb"] + 1:off["fcb"] + 2, 0:U4]
    fc3_b = p_ref[off["fcb"] + 2:off["fcb"] + 3, 0:O]

    def cell(gates, c, H):
        # PyTorch gate order [i | f | g | o]; full-width sigmoid/tanh = 2 EUP passes.
        sig = jax.nn.sigmoid(gates)
        th = jnp.tanh(gates)
        c_new = sig[:, H:2 * H] * c + sig[:, 0:H] * th[:, 2 * H:3 * H]
        h_new = sig[:, 3 * H:4 * H] * jnp.tanh(c_new)
        return h_new, c_new

    # ---- hoisted layer-1 input projection: one batched matmul ---------------
    ih1 = jnp.dot(x_ref[...], w_ih1, preferred_element_type=f32) + b1   # (T*B, G1)

    # ---- wavefront-fused recurrence ------------------------------------------
    # h1_{-1} = c1_{-1} = 0  =>  layer-1 step-0 gates are just ih1[0:B].
    h1, c1 = cell(ih1[0:B], jnp.zeros((B, H1), f32), H1)
    h2 = jnp.zeros((B, H2), f32)
    c2 = jnp.zeros((B, H2), f32)
    for s in range(T):                         # T static -> fully unrolled
        lhs = jnp.concatenate([h1, h2], axis=1)                  # (B, H1+H2)
        comb = jnp.dot(lhs, rhs, preferred_element_type=f32)     # (B, G1+G2)
        # layer-2 gates for step s:  h1_s @ W_ih2 + h2_{s-1} @ W_hh2 + b2
        h2, c2 = cell(comb[:, G1:G1 + G2] + b2, c2, H2)
        # layer-1 gates for step s+1:  h1_s @ W_hh1 + ih1[s+1]
        if s + 1 < T:
            h1, c1 = cell(comb[:, 0:G1] + ih1[(s + 1) * B:(s + 2) * B], c1, H1)
    # h2 is now layer-2's hidden state at the last timestep ( == x[:, -1, :] ).

    # ---- head: fc1 -> relu -> (dropout=id) -> fc2 -> relu -> (dropout=id)
    #            -> fc_last -> softmax(dim=1) ---------------------------------
    z1 = jnp.maximum(jnp.dot(h2, fc1_w, preferred_element_type=f32) + fc1_b, 0.0)
    z2 = jnp.maximum(jnp.dot(z1, fc2_w, preferred_element_type=f32) + fc2_b, 0.0)
    logits = jnp.dot(z2, fc3_w, preferred_element_type=f32) + fc3_b
    logits = logits - jnp.max(logits, axis=1, keepdims=True)
    e = jnp.exp(logits)
    out_ref[...] = e / jnp.sum(e, axis=1, keepdims=True)         # exact softmax


# ----------------------------------------------------------------------------
# Wrapper
# ----------------------------------------------------------------------------
def make_forward(dims):
    D, H1, H2, U3, U4, O = dims
    off = _layout(D, H1, H2, U3, U4, O)

    @jax.jit
    def forward(x, slab):
        B, T, _ = x.shape
        # Time-major flatten; allow_input_fusion lets XLA fold this transpose
        # into the Pallas input instead of a separate HLO + HBM round trip.
        x_tm = jnp.transpose(x, (1, 0, 2)).reshape(T * B, D)
        vmem = pl.BlockSpec(memory_space=pltpu.MemorySpace.VMEM)
        return pl.pallas_call(
            functools.partial(_fused_kernel, B=B, T=T, D=D, H1=H1, H2=H2,
                              U3=U3, U4=U4, O=O, off=off),
            out_shape=jax.ShapeDtypeStruct((B, O), jnp.float32),
            in_specs=[vmem, vmem],
            out_specs=vmem,
            compiler_params=pltpu.CompilerParams(allow_input_fusion=[0]),
        )(x_tm, slab)

    return forward


# ----------------------------------------------------------------------------
# Parameter init (mirrors the PyTorch module's init schemes).
# ----------------------------------------------------------------------------
def init_params(key, input_dim, u1, u2, u3, u4, out_dim):
    ks = jax.random.split(key, 16)

    def xavier_normal(k, shape):            # (fan_out, fan_in)
        fo, fi = shape
        return ((2.0 / (fi + fo)) ** 0.5) * jax.random.normal(k, shape, jnp.float32)

    def orthogonal(k, shape):
        rows, cols = shape
        a = jax.random.normal(k, (max(rows, cols), min(rows, cols)), jnp.float32)
        q, _ = jnp.linalg.qr(a)
        q = q[:rows, :cols] if rows >= cols else q[:cols, :rows].T
        return q.astype(jnp.float32)

    def kaiming_normal(k, shape):           # (fan_out, fan_in)
        _, fi = shape
        return ((2.0 / fi) ** 0.5) * jax.random.normal(k, shape, jnp.float32)

    def uniform(k, shape, bound):
        return jax.random.uniform(k, shape, jnp.float32, -bound, bound)

    p = {}
    kb1 = 1.0 / (u1 ** 0.5)
    p["l1_w_ih"] = xavier_normal(ks[0], (4 * u1, input_dim)).T
    p["l1_w_hh"] = orthogonal(ks[1], (4 * u1, u1)).T
    p["l1_b"] = (uniform(ks[2], (4 * u1,), kb1)
                 + uniform(ks[3], (4 * u1,), kb1)).reshape(1, -1)   # b_ih + b_hh
    kb2 = 1.0 / (u2 ** 0.5)
    p["l2_w_ih"] = xavier_normal(ks[4], (4 * u2, u1)).T
    p["l2_w_hh"] = orthogonal(ks[5], (4 * u2, u2)).T
    p["l2_b"] = (uniform(ks[6], (4 * u2,), kb2)
                 + uniform(ks[7], (4 * u2,), kb2)).reshape(1, -1)
    p["fc1_w"] = kaiming_normal(ks[8], (u3, u2)).T
    p["fc1_b"] = uniform(ks[9], (u3,), 1.0 / (u2 ** 0.5)).reshape(1, -1)
    p["fc2_w"] = kaiming_normal(ks[10], (u4, u3)).T
    p["fc2_b"] = uniform(ks[11], (u4,), 1.0 / (u3 ** 0.5)).reshape(1, -1)
    p["fc3_w"] = kaiming_normal(ks[12], (out_dim, u4)).T
    p["fc3_b"] = uniform(ks[13], (out_dim,), 1.0 / (u4 ** 0.5)).reshape(1, -1)
    return p


# ----------------------------------------------------------------------------
# Pure-JAX reference (correctness check)
# ----------------------------------------------------------------------------
def forward_ref(x, params):
    def lstm(seq, w_ih, w_hh, b):
        B, T, _ = seq.shape
        H = w_hh.shape[0]
        h = jnp.zeros((B, H), jnp.float32)
        c = jnp.zeros((B, H), jnp.float32)
        outs = []
        for t in range(T):
            g = jnp.dot(seq[:, t, :], w_ih) + jnp.dot(h, w_hh) + b
            i = jax.nn.sigmoid(g[:, :H])
            f = jax.nn.sigmoid(g[:, H:2 * H])
            gg = jnp.tanh(g[:, 2 * H:3 * H])
            o = jax.nn.sigmoid(g[:, 3 * H:])
            c = f * c + i * gg
            h = o * jnp.tanh(c)
            outs.append(h)
        return jnp.stack(outs, axis=1)

    h1 = lstm(x, params["l1_w_ih"], params["l1_w_hh"], params["l1_b"])
    h2 = lstm(h1, params["l2_w_ih"], params["l2_w_hh"], params["l2_b"])
    z = h2[:, -1, :]
    z = jnp.maximum(jnp.dot(z, params["fc1_w"]) + params["fc1_b"], 0.0)
    z = jnp.maximum(jnp.dot(z, params["fc2_w"]) + params["fc2_b"], 0.0)
    logits = jnp.dot(z, params["fc3_w"]) + params["fc3_b"]
    return jax.nn.softmax(logits, axis=1)


if __name__ == "__main__":
    # Small shapes consistent with the module's forward.
    B, T = 2, 8
    input_dim, u1, u2, u3, u4, out_dim = 8, 32, 32, 16, 16, 4

    key = jax.random.PRNGKey(0)
    kx, kp = jax.random.split(key)
    x = jax.random.normal(kx, (B, T, input_dim), jnp.float32)
    params = init_params(kp, input_dim, u1, u2, u3, u4, out_dim)

    slab, dims = pack_params(params)
    fwd = make_forward(dims)

    out = jax.block_until_ready(fwd(x, slab))
    ref = jax.block_until_ready(forward_ref(x, params))

    assert out.shape == (B, out_dim)
    assert bool(jnp.all(jnp.isfinite(out)))
    # exact softmax divide -> rows sum to 1 up to f32 rounding
    assert bool(jnp.allclose(jnp.sum(out, axis=1), 1.0, atol=1e-5))
    # matches pure-JAX reference of the full forward
    assert bool(jnp.allclose(out, ref, atol=2e-2))
    print("KERNEL_OK")
</pallas_src>

<mosaic_0001>
module attributes {stable_mosaic.version = 11 : i64} {
  func.func @_fused_kernel(%arg0: memref<16x8xf32, #tpu.memory_space<vmem>>, %arg1: memref<152x256xf32, #tpu.memory_space<vmem>>, %arg2: memref<2x4xf32, #tpu.memory_space<vmem>>) attributes {dimension_semantics = [], scalar_prefetch = 0 : i64, scratch_operands = 0 : i64, tpu.core_type = #tpu.core_type<tc>} {
    %c0 = arith.constant 0 : index
    %c0_0 = arith.constant 0 : index
    %0 = vector.load %arg1[%c0, %c0_0] : memref<152x256xf32, #tpu.memory_space<vmem>>, vector<64x256xf32>
    %c64 = arith.constant 64 : index
    %c0_1 = arith.constant 0 : index
    %1 = vector.load %arg1[%c64, %c0_1] : memref<152x256xf32, #tpu.memory_space<vmem>>, vector<8x128xf32>
    %c72 = arith.constant 72 : index
    %c0_2 = arith.constant 0 : index
    %2 = vector.load %arg1[%c72, %c0_2] : memref<152x256xf32, #tpu.memory_space<vmem>>, vector<1x128xf32>
    %c72_3 = arith.constant 72 : index
    %c128 = arith.constant 128 : index
    %3 = vector.load %arg1[%c72_3, %c128] : memref<152x256xf32, #tpu.memory_space<vmem>>, vector<1x128xf32>
    %c80 = arith.constant 80 : index
    %c0_4 = arith.constant 0 : index
    %4 = vector.load %arg1[%c80, %c0_4] : memref<152x256xf32, #tpu.memory_space<vmem>>, vector<32x16xf32>
    %c112 = arith.constant 112 : index
    %c0_5 = arith.constant 0 : index
    %5 = vector.load %arg1[%c112, %c0_5] : memref<152x256xf32, #tpu.memory_space<vmem>>, vector<16x16xf32>
    %c128_6 = arith.constant 128 : index
    %c0_7 = arith.constant 0 : index
    %6 = vector.load %arg1[%c128_6, %c0_7] : memref<152x256xf32, #tpu.memory_space<vmem>>, vector<16x4xf32>
    %c144 = arith.constant 144 : index
    %c0_8 = arith.constant 0 : index
    %7 = vector.load %arg1[%c144, %c0_8] : memref<152x256xf32, #tpu.memory_space<vmem>>, vector<1x16xf32>
    %c145 = arith.constant 145 : index
    %c0_9 = arith.constant 0 : index
    %8 = vector.load %arg1[%c145, %c0_9] : memref<152x256xf32, #tpu.memory_space<vmem>>, vector<1x16xf32>
    %c146 = arith.constant 146 : index
    %c0_10 = arith.constant 0 : index
    %9 = vector.load %arg1[%c146, %c0_10] : memref<152x256xf32, #tpu.memory_space<vmem>>, vector<1x4xf32>
    %c0_11 = arith.constant 0 : index
    %c0_12 = arith.constant 0 : index
    %10 = vector.load %arg0[%c0_11, %c0_12] : memref<16x8xf32, #tpu.memory_space<vmem>>, vector<16x8xf32>
    %cst = arith.constant dense<0.000000e+00> : vector<16x128xf32>
    %11 = tpu.matmul %10, %1, %cst {dimension_numbers = #tpu.dot_dimension_numbers<[1], [0], [0], [1], [0, 0, 1, 1], [], []>} : vector<16x8xf32>, vector<8x128xf32>, vector<16x128xf32> -> vector<16x128xf32>
    %12 = vector.broadcast %2 : vector<1x128xf32> to vector<16x128xf32>
    %13 = arith.addf %11, %12 : vector<16x128xf32>
    %14 = vector.extract_strided_slice %13 {offsets = [0, 0], sizes = [2, 128], strides = [1, 1]} : vector<16x128xf32> to vector<2x128xf32>
    %cst_13 = arith.constant 0.000000e+00 : f32
    %15 = vector.broadcast %cst_13 : f32 to vector<2x32xf32>
    %16 = arith.negf %14 : vector<2x128xf32>
    %17 = math.exp %16 : vector<2x128xf32>
    %cst_14 = arith.constant 1.000000e+00 : f32
    %18 = vector.broadcast %cst_14 : f32 to vector<2x128xf32>
    %19 = arith.addf %18, %17 : vector<2x128xf32>
    %20 = arith.divf %18, %19 : vector<2x128xf32>
    %21 = math.tanh %14 : vector<2x128xf32>
    %22 = vector.extract_strided_slice %20 {offsets = [0, 32], sizes = [2, 32], strides = [1, 1]} : vector<2x128xf32> to vector<2x32xf32>
    %23 = arith.mulf %22, %15 : vector<2x32xf32>
    %24 = vector.extract_strided_slice %20 {offsets = [0, 0], sizes = [2, 32], strides = [1, 1]} : vector<2x128xf32> to vector<2x32xf32>
    %25 = vector.extract_strided_slice %21 {offsets = [0, 64], sizes = [2, 32], strides = [1, 1]} : vector<2x128xf32> to vector<2x32xf32>
    %26 = arith.mulf %24, %25 : vector<2x32xf32>
    %27 = arith.addf %23, %26 : vector<2x32xf32>
    %28 = vector.extract_strided_slice %20 {offsets = [0, 96], sizes = [2, 32], strides = [1, 1]} : vector<2x128xf32> to vector<2x32xf32>
    %29 = math.tanh %27 : vector<2x32xf32>
    %30 = arith.mulf %28, %29 : vector<2x32xf32>
    %cst_15 = arith.constant 0.000000e+00 : f32
    %31 = vector.broadcast %cst_15 : f32 to vector<2x32xf32>
    %cst_16 = arith.constant 0.000000e+00 : f32
    %32 = vector.broadcast %cst_16 : f32 to vector<2x32xf32>
    %33 = tpu.concatenate %30, %31 in 1 : vector<2x32xf32>, vector<2x32xf32> -> vector<2x64xf32>
    %cst_17 = arith.constant dense<0.000000e+00> : vector<2x256xf32>
    %34 = tpu.matmul %33, %0, %cst_17 {dimension_numbers = #tpu.dot_dimension_numbers<[1], [0], [0], [1], [0, 0, 1, 1], [], []>} : vector<2x64xf32>, vector<64x256xf32>, vector<2x256xf32> -> vector<2x256xf32>
    %35 = vector.extract_strided_slice %34 {offsets = [0, 128], sizes = [2, 128], strides = [1, 1]} : vector<2x256xf32> to vector<2x128xf32>
    %36 = vector.broadcast %3 : vector<1x128xf32> to vector<2x128xf32>
    %37 = arith.addf %35, %36 : vector<2x128xf32>
    %38 = arith.negf %37 : vector<2x128xf32>
    %39 = math.exp %38 : vector<2x128xf32>
    %cst_18 = arith.constant 1.000000e+00 : f32
    %40 = vector.broadcast %cst_18 : f32 to vector<2x128xf32>
    %41 = arith.addf %40, %39 : vector<2x128xf32>
    %42 = arith.divf %40, %41 : vector<2x128xf32>
    %43 = math.tanh %37 : vector<2x128xf32>
    %44 = vector.extract_strided_slice %42 {offsets = [0, 32], sizes = [2, 32], strides = [1, 1]} : vector<2x128xf32> to vector<2x32xf32>
    %45 = arith.mulf %44, %32 : vector<2x32xf32>
    %46 = vector.extract_strided_slice %42 {offsets = [0, 0], sizes = [2, 32], strides = [1, 1]} : vector<2x128xf32> to vector<2x32xf32>
    %47 = vector.extract_strided_slice %43 {offsets = [0, 64], sizes = [2, 32], strides = [1, 1]} : vector<2x128xf32> to vector<2x32xf32>
    %48 = arith.mulf %46, %47 : vector<2x32xf32>
    %49 = arith.addf %45, %48 : vector<2x32xf32>
    %50 = vector.extract_strided_slice %42 {offsets = [0, 96], sizes = [2, 32], strides = [1, 1]} : vector<2x128xf32> to vector<2x32xf32>
    %51 = math.tanh %49 : vector<2x32xf32>
    %52 = arith.mulf %50, %51 : vector<2x32xf32>
    %53 = vector.extract_strided_slice %34 {offsets = [0, 0], sizes = [2, 128], strides = [1, 1]} : vector<2x256xf32> to vector<2x128xf32>
    %54 = vector.extract_strided_slice %13 {offsets = [2, 0], sizes = [2, 128], strides = [1, 1]} : vector<16x128xf32> to vector<2x128xf32>
    %55 = arith.addf %53, %54 : vector<2x128xf32>
    %56 = arith.negf %55 : vector<2x128xf32>
    %57 = math.exp %56 : vector<2x128xf32>
    %cst_19 = arith.constant 1.000000e+00 : f32
    %58 = vector.broadcast %cst_19 : f32 to vector<2x128xf32>
    %59 = arith.addf %58, %57 : vector<2x128xf32>
    %60 = arith.divf %58, %59 : vector<2x128xf32>
    %61 = math.tanh %55 : vector<2x128xf32>
    %62 = vector.extract_strided_slice %60 {offsets = [0, 32], sizes = [2, 32], strides = [1, 1]} : vector<2x128xf32> to vector<2x32xf32>
    %63 = arith.mulf %62, %27 : vector<2x32xf32>
    %64 = vector.extract_strided_slice %60 {offsets = [0, 0], sizes = [2, 32], strides = [1, 1]} : vector<2x128xf32> to vector<2x32xf32>
    %65 = vector.extract_strided_slice %61 {offsets = [0, 64], sizes = [2, 32], strides = [1, 1]} : vector<2x128xf32> to vector<2x32xf32>
    %66 = arith.mulf %64, %65 : vector<2x32xf32>
    %67 = arith.addf %63, %66 : vector<2x32xf32>
    %68 = vector.extract_strided_slice %60 {offsets = [0, 96], sizes = [2, 32], strides = [1, 1]} : vector<2x128xf32> to vector<2x32xf32>
    %69 = math.tanh %67 : vector<2x32xf32>
    %70 = arith.mulf %68, %69 : vector<2x32xf32>
    %71 = tpu.concatenate %70, %52 in 1 : vector<2x32xf32>, vector<2x32xf32> -> vector<2x64xf32>
    %cst_20 = arith.constant dense<0.000000e+00> : vector<2x256xf32>
    %72 = tpu.matmul %71, %0, %cst_20 {dimension_numbers = #tpu.dot_dimension_numbers<[1], [0], [0], [1], [0, 0, 1, 1], [], []>} : vector<2x64xf32>, vector<64x256xf32>, vector<2x256xf32> -> vector<2x256xf32>
    %73 = vector.extract_strided_slice %72 {offsets = [0, 128], sizes = [2, 128], strides = [1, 1]} : vector<2x256xf32> to vector<2x128xf32>
    %74 = vector.broadcast %3 : vector<1x128xf32> to vector<2x128xf32>
    %75 = arith.addf %73, %74 : vector<2x128xf32>
    %76 = arith.negf %75 : vector<2x128xf32>
    %77 = math.exp %76 : vector<2x128xf32>
    %cst_21 = arith.constant 1.000000e+00 : f32
    %78 = vector.broadcast %cst_21 : f32 to vector<2x128xf32>
    %79 = arith.addf %78, %77 : vector<2x128xf32>
    %80 = arith.divf %78, %79 : vector<2x128xf32>
    %81 = math.tanh %75 : vector<2x128xf32>
    %82 = vector.extract_strided_slice %80 {offsets = [0, 32], sizes = [2, 32], strides = [1, 1]} : vector<2x128xf32> to vector<2x32xf32>
    %83 = arith.mulf %82, %49 : vector<2x32xf32>
    %84 = vector.extract_strided_slice %80 {offsets = [0, 0], sizes = [2, 32], strides = [1, 1]} : vector<2x128xf32> to vector<2x32xf32>
    %85 = vector.extract_strided_slice %81 {offsets = [0, 64], sizes = [2, 32], strides = [1, 1]} : vector<2x128xf32> to vector<2x32xf32>
    %86 = arith.mulf %84, %85 : vector<2x32xf32>
    %87 = arith.addf %83, %86 : vector<2x32xf32>
    %88 = vector.extract_strided_slice %80 {offsets = [0, 96], sizes = [2, 32], strides = [1, 1]} : vector<2x128xf32> to vector<2x32xf32>
    %89 = math.tanh %87 : vector<2x32xf32>
    %90 = arith.mulf %88, %89 : vector<2x32xf32>
    %91 = vector.extract_strided_slice %72 {offsets = [0, 0], sizes = [2, 128], strides = [1, 1]} : vector<2x256xf32> to vector<2x128xf32>
    %92 = vector.extract_strided_slice %13 {offsets = [4, 0], sizes = [2, 128], strides = [1, 1]} : vector<16x128xf32> to vector<2x128xf32>
    %93 = arith.addf %91, %92 : vector<2x128xf32>
    %94 = arith.negf %93 : vector<2x128xf32>
    %95 = math.exp %94 : vector<2x128xf32>
    %cst_22 = arith.constant 1.000000e+00 : f32
    %96 = vector.broadcast %cst_22 : f32 to vector<2x128xf32>
    %97 = arith.addf %96, %95 : vector<2x128xf32>
    %98 = arith.divf %96, %97 : vector<2x128xf32>
    %99 = math.tanh %93 : vector<2x128xf32>
    %100 = vector.extract_strided_slice %98 {offsets = [0, 32], sizes = [2, 32], strides = [1, 1]} : vector<2x128xf32> to vector<2x32xf32>
    %101 = arith.mulf %100, %67 : vector<2x32xf32>
    %102 = vector.extract_strided_slice %98 {offsets = [0, 0], sizes = [2, 32], strides = [1, 1]} : vector<2x128xf32> to vector<2x32xf32>
    %103 = vector.extract_strided_slice %99 {offsets = [0, 64], sizes = [2, 32], strides = [1, 1]} : vector<2x128xf32> to vector<2x32xf32>
    %104 = arith.mulf %102, %103 : vector<2x32xf32>
    %105 = arith.addf %101, %104 : vector<2x32xf32>
    %106 = vector.extract_strided_slice %98 {offsets = [0, 96], sizes = [2, 32], strides = [1, 1]} : vector<2x128xf32> to vector<2x32xf32>
    %107 = math.tanh %105 : vector<2x32xf32>
    %108 = arith.mulf %106, %107 : vector<2x32xf32>
    %109 = tpu.concatenate %108, %90 in 1 : vector<2x32xf32>, vector<2x32xf32> -> vector<2x64xf32>
    %cst_23 = arith.constant dense<0.000000e+00> : vector<2x256xf32>
    %110 = tpu.matmul %109, %0, %cst_23 {dimension_numbers = #tpu.dot_dimension_numbers<[1], [0], [0], [1], [0, 0, 1, 1], [], []>} : vector<2x64xf32>, vector<64x256xf32>, vector<2x256xf32> -> vector<2x256xf32>
    %111 = vector.extract_strided_slice %110 {offsets = [0, 128], sizes = [2, 128], strides = [1, 1]} : vector<2x256xf32> to vector<2x128xf32>
    %112 = vector.broadcast %3 : vector<1x128xf32> to vector<2x128xf32>
    %113 = arith.addf %111, %112 : vector<2x128xf32>
    %114 = arith.negf %113 : vector<2x128xf32>
    %115 = math.exp %114 : vector<2x128xf32>
    %cst_24 = arith.constant 1.000000e+00 : f32
    %116 = vector.broadcast %cst_24 : f32 to vector<2x128xf32>
    %117 = arith.addf %116, %115 : vector<2x128xf32>
    %118 = arith.divf %116, %117 : vector<2x128xf32>
    %119 = math.tanh %113 : vector<2x128xf32>
    %120 = vector.extract_strided_slice %118 {offsets = [0, 32], sizes = [2, 32], strides = [1, 1]} : vector<2x128xf32> to vector<2x32xf32>
    %121 = arith.mulf %120, %87 : vector<2x32xf32>
    %122 = vector.extract_strided_slice %118 {offsets = [0, 0], sizes = [2, 32], strides = [1, 1]} : vector<2x128xf32> to vector<2x32xf32>
    %123 = vector.extract_strided_slice %119 {offsets = [0, 64], sizes = [2, 32], strides = [1, 1]} : vector<2x128xf32> to vector<2x32xf32>
    %124 = arith.mulf %122, %123 : vector<2x32xf32>
    %125 = arith.addf %121, %124 : vector<2x32xf32>
    %126 = vector.extract_strided_slice %118 {offsets = [0, 96], sizes = [2, 32], strides = [1, 1]} : vector<2x128xf32> to vector<2x32xf32>
    %127 = math.tanh %125 : vector<2x32xf32>
    %128 = arith.mulf %126, %127 : vector<2x32xf32>
    %129 = vector.extract_strided_slice %110 {offsets = [0, 0], sizes = [2, 128], strides = [1, 1]} : vector<2x256xf32> to vector<2x128xf32>
    %130 = vector.extract_strided_slice %13 {offsets = [6, 0], sizes = [2, 128], strides = [1, 1]} : vector<16x128xf32> to vector<2x128xf32>
    %131 = arith.addf %129, %130 : vector<2x128xf32>
    %132 = arith.negf %131 : vector<2x128xf32>
    %133 = math.exp %132 : vector<2x128xf32>
    %cst_25 = arith.constant 1.000000e+00 : f32
    %134 = vector.broadcast %cst_25 : f32 to vector<2x128xf32>
    %135 = arith.addf %134, %133 : vector<2x128xf32>
    %136 = arith.divf %134, %135 : vector<2x128xf32>
    %137 = math.tanh %131 : vector<2x128xf32>
    %138 = vector.extract_strided_slice %136 {offsets = [0, 32], sizes = [2, 32], strides = [1, 1]} : vector<2x128xf32> to vector<2x32xf32>
    %139 = arith.mulf %138, %105 : vector<2x32xf32>
    %140 = vector.extract_strided_slice %136 {offsets = [0, 0], sizes = [2, 32], strides = [1, 1]} : vector<2x128xf32> to vector<2x32xf32>
    %141 = vector.extract_strided_slice %137 {offsets = [0, 64], sizes = [2, 32], strides = [1, 1]} : vector<2x128xf32> to vector<2x32xf32>
    %142 = arith.mulf %140, %141 : vector<2x32xf32>
    %143 = arith.addf %139, %142 : vector<2x32xf32>
    %144 = vector.extract_strided_slice %136 {offsets = [0, 96], sizes = [2, 32], strides = [1, 1]} : vector<2x128xf32> to vector<2x32xf32>
    %145 = math.tanh %143 : vector<2x32xf32>
    %146 = arith.mulf %144, %145 : vector<2x32xf32>
    %147 = tpu.concatenate %146, %128 in 1 : vector<2x32xf32>, vector<2x32xf32> -> vector<2x64xf32>
    %cst_26 = arith.constant dense<0.000000e+00> : vector<2x256xf32>
    %148 = tpu.matmul %147, %0, %cst_26 {dimension_numbers = #tpu.dot_dimension_numbers<[1], [0], [0], [1], [0, 0, 1, 1], [], []>} : vector<2x64xf32>, vector<64x256xf32>, vector<2x256xf32> -> vector<2x256xf32>
    %149 = vector.extract_strided_slice %148 {offsets = [0, 128], sizes = [2, 128], strides = [1, 1]} : vector<2x256xf32> to vector<2x128xf32>
    %150 = vector.broadcast %3 : vector<1x128xf32> to vector<2x128xf32>
    %151 = arith.addf %149, %150 : vector<2x128xf32>
    %152 = arith.negf %151 : vector<2x128xf32>
    %153 = math.exp %152 : vector<2x128xf32>
    %cst_27 = arith.constant 1.000000e+00 : f32
    %154 = vector.broadcast %cst_27 : f32 to vector<2x128xf32>
    %155 = arith.addf %154, %153 : vector<2x128xf32>
    %156 = arith.divf %154, %155 : vector<2x128xf32>
    %157 = math.tanh %151 : vector<2x128xf32>
    %158 = vector.extract_strided_slice %156 {offsets = [0, 32], sizes = [2, 32], strides = [1, 1]} : vector<2x128xf32> to vector<2x32xf32>
    %159 = arith.mulf %158, %125 : vector<2x32xf32>
    %160 = vector.extract_strided_slice %156 {offsets = [0, 0], sizes = [2, 32], strides = [1, 1]} : vector<2x128xf32> to vector<2x32xf32>
    %161 = vector.extract_strided_slice %157 {offsets = [0, 64], sizes = [2, 32], strides = [1, 1]} : vector<2x128xf32> to vector<2x32xf32>
    %162 = arith.mulf %160, %161 : vector<2x32xf32>
    %163 = arith.addf %159, %162 : vector<2x32xf32>
    %164 = vector.extract_strided_slice %156 {offsets = [0, 96], sizes = [2, 32], strides = [1, 1]} : vector<2x128xf32> to vector<2x32xf32>
    %165 = math.tanh %163 : vector<2x32xf32>
    %166 = arith.mulf %164, %165 : vector<2x32xf32>
    %167 = vector.extract_strided_slice %148 {offsets = [0, 0], sizes = [2, 128], strides = [1, 1]} : vector<2x256xf32> to vector<2x128xf32>
    %168 = vector.extract_strided_slice %13 {offsets = [8, 0], sizes = [2, 128], strides = [1, 1]} : vector<16x128xf32> to vector<2x128xf32>
    %169 = arith.addf %167, %168 : vector<2x128xf32>
    %170 = arith.negf %169 : vector<2x128xf32>
    %171 = math.exp %170 : vector<2x128xf32>
    %cst_28 = arith.constant 1.000000e+00 : f32
    %172 = vector.broadcast %cst_28 : f32 to vector<2x128xf32>
    %173 = arith.addf %172, %171 : vector<2x128xf32>
    %174 = arith.divf %172, %173 : vector<2x128xf32>
    %175 = math.tanh %169 : vector<2x128xf32>
    %176 = vector.extract_strided_slice %174 {offsets = [0, 32], sizes = [2, 32], strides = [1, 1]} : vector<2x128xf32> to vector<2x32xf32>
    %177 = arith.mulf %176, %143 : vector<2x32xf32>
    %178 = vector.extract_strided_slice %174 {offsets = [0, 0], sizes = [2, 32], strides = [1, 1]} : vector<2x128xf32> to vector<2x32xf32>
    %179 = vector.extract_strided_slice %175 {offsets = [0, 64], sizes = [2, 32], strides = [1, 1]} : vector<2x128xf32> to vector<2x32xf32>
    %180 = arith.mulf %178, %179 : vector<2x32xf32>
    %181 = arith.addf %177, %180 : vector<2x32xf32>
    %182 = vector.extract_strided_slice %174 {offsets = [0, 96], sizes = [2, 32], strides = [1, 1]} : vector<2x128xf32> to vector<2x32xf32>
    %183 = math.tanh %181 : vector<2x32xf32>
    %184 = arith.mulf %182, %183 : vector<2x32xf32>
    %185 = tpu.concatenate %184, %166 in 1 : vector<2x32xf32>, vector<2x32xf32> -> vector<2x64xf32>
    %cst_29 = arith.constant dense<0.000000e+00> : vector<2x256xf32>
    %186 = tpu.matmul %185, %0, %cst_29 {dimension_numbers = #tpu.dot_dimension_numbers<[1], [0], [0], [1], [0, 0, 1, 1], [], []>} : vector<2x64xf32>, vector<64x256xf32>, vector<2x256xf32> -> vector<2x256xf32>
    %187 = vector.extract_strided_slice %186 {offsets = [0, 128], sizes = [2, 128], strides = [1, 1]} : vector<2x256xf32> to vector<2x128xf32>
    %188 = vector.broadcast %3 : vector<1x128xf32> to vector<2x128xf32>
    %189 = arith.addf %187, %188 : vector<2x128xf32>
    %190 = arith.negf %189 : vector<2x128xf32>
    %191 = math.exp %190 : vector<2x128xf32>
    %cst_30 = arith.constant 1.000000e+00 : f32
    %192 = vector.broadcast %cst_30 : f32 to vector<2x128xf32>
    %193 = arith.addf %192, %191 : vector<2x128xf32>
    %194 = arith.divf %192, %193 : vector<2x128xf32>
    %195 = math.tanh %189 : vector<2x128xf32>
    %196 = vector.extract_strided_slice %194 {offsets = [0, 32], sizes = [2, 32], strides = [1, 1]} : vector<2x128xf32> to vector<2x32xf32>
    %197 = arith.mulf %196, %163 : vector<2x32xf32>
    %198 = vector.extract_strided_slice %194 {offsets = [0, 0], sizes = [2, 32], strides = [1, 1]} : vector<2x128xf32> to vector<2x32xf32>
    %199 = vector.extract_strided_slice %195 {offsets = [0, 64], sizes = [2, 32], strides = [1, 1]} : vector<2x128xf32> to vector<2x32xf32>
    %200 = arith.mulf %198, %199 : vector<2x32xf32>
    %201 = arith.addf %197, %200 : vector<2x32xf32>
    %202 = vector.extract_strided_slice %194 {offsets = [0, 96], sizes = [2, 32], strides = [1, 1]} : vector<2x128xf32> to vector<2x32xf32>
    %203 = math.tanh %201 : vector<2x32xf32>
    %204 = arith.mulf %202, %203 : vector<2x32xf32>
    %205 = vector.extract_strided_slice %186 {offsets = [0, 0], sizes = [2, 128], strides = [1, 1]} : vector<2x256xf32> to vector<2x128xf32>
    %206 = vector.extract_strided_slice %13 {offsets = [10, 0], sizes = [2, 128], strides = [1, 1]} : vector<16x128xf32> to vector<2x128xf32>
    %207 = arith.addf %205, %206 : vector<2x128xf32>
    %208 = arith.negf %207 : vector<2x128xf32>
    %209 = math.exp %208 : vector<2x128xf32>
    %cst_31 = arith.constant 1.000000e+00 : f32
    %210 = vector.broadcast %cst_31 : f32 to vector<2x128xf32>
    %211 = arith.addf %210, %209 : vector<2x128xf32>
    %212 = arith.divf %210, %211 : vector<2x128xf32>
    %213 = math.tanh %207 : vector<2x128xf32>
    %214 = vector.extract_strided_slice %212 {offsets = [0, 32], sizes = [2, 32], strides = [1, 1]} : vector<2x128xf32> to vector<2x32xf32>
    %215 = arith.mulf %214, %181 : vector<2x32xf32>
    %216 = vector.extract_strided_slice %212 {offsets = [0, 0], sizes = [2, 32], strides = [1, 1]} : vector<2x128xf32> to vector<2x32xf32>
    %217 = vector.extract_strided_slice %213 {offsets = [0, 64], sizes = [2, 32], strides = [1, 1]} : vector<2x128xf32> to vector<2x32xf32>
    %218 = arith.mulf %216, %217 : vector<2x32xf32>
    %219 = arith.addf %215, %218 : vector<2x32xf32>
    %220 = vector.extract_strided_slice %212 {offsets = [0, 96], sizes = [2, 32], strides = [1, 1]} : vector<2x128xf32> to vector<2x32xf32>
    %221 = math.tanh %219 : vector<2x32xf32>
    %222 = arith.mulf %220, %221 : vector<2x32xf32>
    %223 = tpu.concatenate %222, %204 in 1 : vector<2x32xf32>, vector<2x32xf32> -> vector<2x64xf32>
    %cst_32 = arith.constant dense<0.000000e+00> : vector<2x256xf32>
    %224 = tpu.matmul %223, %0, %cst_32 {dimension_numbers = #tpu.dot_dimension_numbers<[1], [0], [0], [1], [0, 0, 1, 1], [], []>} : vector<2x64xf32>, vector<64x256xf32>, vector<2x256xf32> -> vector<2x256xf32>
    %225 = vector.extract_strided_slice %224 {offsets = [0, 128], sizes = [2, 128], strides = [1, 1]} : vector<2x256xf32> to vector<2x128xf32>
    %226 = vector.broadcast %3 : vector<1x128xf32> to vector<2x128xf32>
    %227 = arith.addf %225, %226 : vector<2x128xf32>
    %228 = arith.negf %227 : vector<2x128xf32>
    %229 = math.exp %228 : vector<2x128xf32>
    %cst_33 = arith.constant 1.000000e+00 : f32
    %230 = vector.broadcast %cst_33 : f32 to vector<2x128xf32>
    %231 = arith.addf %230, %229 : vector<2x128xf32>
    %232 = arith.divf %230, %231 : vector<2x128xf32>
    %233 = math.tanh %227 : vector<2x128xf32>
    %234 = vector.extract_strided_slice %232 {offsets = [0, 32], sizes = [2, 32], strides = [1, 1]} : vector<2x128xf32> to vector<2x32xf32>
    %235 = arith.mulf %234, %201 : vector<2x32xf32>
    %236 = vector.extract_strided_slice %232 {offsets = [0, 0], sizes = [2, 32], strides = [1, 1]} : vector<2x128xf32> to vector<2x32xf32>
    %237 = vector.extract_strided_slice %233 {offsets = [0, 64], sizes = [2, 32], strides = [1, 1]} : vector<2x128xf32> to vector<2x32xf32>
    %238 = arith.mulf %236, %237 : vector<2x32xf32>
    %239 = arith.addf %235, %238 : vector<2x32xf32>
    %240 = vector.extract_strided_slice %232 {offsets = [0, 96], sizes = [2, 32], strides = [1, 1]} : vector<2x128xf32> to vector<2x32xf32>
    %241 = math.tanh %239 : vector<2x32xf32>
    %242 = arith.mulf %240, %241 : vector<2x32xf32>
    %243 = vector.extract_strided_slice %224 {offsets = [0, 0], sizes = [2, 128], strides = [1, 1]} : vector<2x256xf32> to vector<2x128xf32>
    %244 = vector.extract_strided_slice %13 {offsets = [12, 0], sizes = [2, 128], strides = [1, 1]} : vector<16x128xf32> to vector<2x128xf32>
    %245 = arith.addf %243, %244 : vector<2x128xf32>
    %246 = arith.negf %245 : vector<2x128xf32>
    %247 = math.exp %246 : vector<2x128xf32>
    %cst_34 = arith.constant 1.000000e+00 : f32
    %248 = vector.broadcast %cst_34 : f32 to vector<2x128xf32>
    %249 = arith.addf %248, %247 : vector<2x128xf32>
    %250 = arith.divf %248, %249 : vector<2x128xf32>
    %251 = math.tanh %245 : vector<2x128xf32>
    %252 = vector.extract_strided_slice %250 {offsets = [0, 32], sizes = [2, 32], strides = [1, 1]} : vector<2x128xf32> to vector<2x32xf32>
    %253 = arith.mulf %252, %219 : vector<2x32xf32>
    %254 = vector.extract_strided_slice %250 {offsets = [0, 0], sizes = [2, 32], strides = [1, 1]} : vector<2x128xf32> to vector<2x32xf32>
    %255 = vector.extract_strided_slice %251 {offsets = [0, 64], sizes = [2, 32], strides = [1, 1]} : vector<2x128xf32> to vector<2x32xf32>
    %256 = arith.mulf %254, %255 : vector<2x32xf32>
    %257 = arith.addf %253, %256 : vector<2x32xf32>
    %258 = vector.extract_strided_slice %250 {offsets = [0, 96], sizes = [2, 32], strides = [1, 1]} : vector<2x128xf32> to vector<2x32xf32>
    %259 = math.tanh %257 : vector<2x32xf32>
    %260 = arith.mulf %258, %259 : vector<2x32xf32>
    %261 = tpu.concatenate %260, %242 in 1 : vector<2x32xf32>, vector<2x32xf32> -> vector<2x64xf32>
    %cst_35 = arith.constant dense<0.000000e+00> : vector<2x256xf32>
    %262 = tpu.matmul %261, %0, %cst_35 {dimension_numbers = #tpu.dot_dimension_numbers<[1], [0], [0], [1], [0, 0, 1, 1], [], []>} : vector<2x64xf32>, vector<64x256xf32>, vector<2x256xf32> -> vector<2x256xf32>
    %263 = vector.extract_strided_slice %262 {offsets = [0, 128], sizes = [2, 128], strides = [1, 1]} : vector<2x256xf32> to vector<2x128xf32>
    %264 = vector.broadcast %3 : vector<1x128xf32> to vector<2x128xf32>
    %265 = arith.addf %263, %264 : vector<2x128xf32>
    %266 = arith.negf %265 : vector<2x128xf32>
    %267 = math.exp %266 : vector<2x128xf32>
    %cst_36 = arith.constant 1.000000e+00 : f32
    %268 = vector.broadcast %cst_36 : f32 to vector<2x128xf32>
    %269 = arith.addf %268, %267 : vector<2x128xf32>
    %270 = arith.divf %268, %269 : vector<2x128xf32>
    %271 = math.tanh %265 : vector<2x128xf32>
    %272 = vector.extract_strided_slice %270 {offsets = [0, 32], sizes = [2, 32], strides = [1, 1]} : vector<2x128xf32> to vector<2x32xf32>
    %273 = arith.mulf %272, %239 : vector<2x32xf32>
    %274 = vector.extract_strided_slice %270 {offsets = [0, 0], sizes = [2, 32], strides = [1, 1]} : vector<2x128xf32> to vector<2x32xf32>
    %275 = vector.extract_strided_slice %271 {offsets = [0, 64], sizes = [2, 32], strides = [1, 1]} : vector<2x128xf32> to vector<2x32xf32>
    %276 = arith.mulf %274, %275 : vector<2x32xf32>
    %277 = arith.addf %273, %276 : vector<2x32xf32>
    %278 = vector.extract_strided_slice %270 {offsets = [0, 96], sizes = [2, 32], strides = [1, 1]} : vector<2x128xf32> to vector<2x32xf32>
    %279 = math.tanh %277 : vector<2x32xf32>
    %280 = arith.mulf %278, %279 : vector<2x32xf32>
    %281 = vector.extract_strided_slice %262 {offsets = [0, 0], sizes = [2, 128], strides = [1, 1]} : vector<2x256xf32> to vector<2x128xf32>
    %282 = vector.extract_strided_slice %13 {offsets = [14, 0], sizes = [2, 128], strides = [1, 1]} : vector<16x128xf32> to vector<2x128xf32>
    %283 = arith.addf %281, %282 : vector<2x128xf32>
    %284 = arith.negf %283 : vector<2x128xf32>
    %285 = math.exp %284 : vector<2x128xf32>
    %cst_37 = arith.constant 1.000000e+00 : f32
    %286 = vector.broadcast %cst_37 : f32 to vector<2x128xf32>
    %287 = arith.addf %286, %285 : vector<2x128xf32>
    %288 = arith.divf %286, %287 : vector<2x128xf32>
    %289 = math.tanh %283 : vector<2x128xf32>
    %290 = vector.extract_strided_slice %288 {offsets = [0, 32], sizes = [2, 32], strides = [1, 1]} : vector<2x128xf32> to vector<2x32xf32>
    %291 = arith.mulf %290, %257 : vector<2x32xf32>
    %292 = vector.extract_strided_slice %288 {offsets = [0, 0], sizes = [2, 32], strides = [1, 1]} : vector<2x128xf32> to vector<2x32xf32>
    %293 = vector.extract_strided_slice %289 {offsets = [0, 64], sizes = [2, 32], strides = [1, 1]} : vector<2x128xf32> to vector<2x32xf32>
    %294 = arith.mulf %292, %293 : vector<2x32xf32>
    %295 = arith.addf %291, %294 : vector<2x32xf32>
    %296 = vector.extract_strided_slice %288 {offsets = [0, 96], sizes = [2, 32], strides = [1, 1]} : vector<2x128xf32> to vector<2x32xf32>
    %297 = math.tanh %295 : vector<2x32xf32>
    %298 = arith.mulf %296, %297 : vector<2x32xf32>
    %299 = tpu.concatenate %298, %280 in 1 : vector<2x32xf32>, vector<2x32xf32> -> vector<2x64xf32>
    %cst_38 = arith.constant dense<0.000000e+00> : vector<2x256xf32>
    %300 = tpu.matmul %299, %0, %cst_38 {dimension_numbers = #tpu.dot_dimension_numbers<[1], [0], [0], [1], [0, 0, 1, 1], [], []>} : vector<2x64xf32>, vector<64x256xf32>, vector<2x256xf32> -> vector<2x256xf32>
    %301 = vector.extract_strided_slice %300 {offsets = [0, 128], sizes = [2, 128], strides = [1, 1]} : vector<2x256xf32> to vector<2x128xf32>
    %302 = vector.broadcast %3 : vector<1x128xf32> to vector<2x128xf32>
    %303 = arith.addf %301, %302 : vector<2x128xf32>
    %304 = arith.negf %303 : vector<2x128xf32>
    %305 = math.exp %304 : vector<2x128xf32>
    %cst_39 = arith.constant 1.000000e+00 : f32
    %306 = vector.broadcast %cst_39 : f32 to vector<2x128xf32>
    %307 = arith.addf %306, %305 : vector<2x128xf32>
    %308 = arith.divf %306, %307 : vector<2x128xf32>
    %309 = math.tanh %303 : vector<2x128xf32>
    %310 = vector.extract_strided_slice %308 {offsets = [0, 32], sizes = [2, 32], strides = [1, 1]} : vector<2x128xf32> to vector<2x32xf32>
    %311 = arith.mulf %310, %277 : vector<2x32xf32>
    %312 = vector.extract_strided_slice %308 {offsets = [0, 0], sizes = [2, 32], strides = [1, 1]} : vector<2x128xf32> to vector<2x32xf32>
    %313 = vector.extract_strided_slice %309 {offsets = [0, 64], sizes = [2, 32], strides = [1, 1]} : vector<2x128xf32> to vector<2x32xf32>
    %314 = arith.mulf %312, %313 : vector<2x32xf32>
    %315 = arith.addf %311, %314 : vector<2x32xf32>
    %316 = vector.extract_strided_slice %308 {offsets = [0, 96], sizes = [2, 32], strides = [1, 1]} : vector<2x128xf32> to vector<2x32xf32>
    %317 = math.tanh %315 : vector<2x32xf32>
    %318 = arith.mulf %316, %317 : vector<2x32xf32>
    %cst_40 = arith.constant dense<0.000000e+00> : vector<2x16xf32>
    %319 = tpu.matmul %318, %4, %cst_40 {dimension_numbers = #tpu.dot_dimension_numbers<[1], [0], [0], [1], [0, 0, 1, 1], [], []>} : vector<2x32xf32>, vector<32x16xf32>, vector<2x16xf32> -> vector<2x16xf32>
    %320 = vector.broadcast %7 : vector<1x16xf32> to vector<2x16xf32>
    %321 = arith.addf %319, %320 : vector<2x16xf32>
    %cst_41 = arith.constant 0.000000e+00 : f32
    %322 = vector.broadcast %cst_41 : f32 to vector<2x16xf32>
    %323 = arith.maximumf %321, %322 : vector<2x16xf32>
    %cst_42 = arith.constant dense<0.000000e+00> : vector<2x16xf32>
    %324 = tpu.matmul %323, %5, %cst_42 {dimension_numbers = #tpu.dot_dimension_numbers<[1], [0], [0], [1], [0, 0, 1, 1], [], []>} : vector<2x16xf32>, vector<16x16xf32>, vector<2x16xf32> -> vector<2x16xf32>
    %325 = vector.broadcast %8 : vector<1x16xf32> to vector<2x16xf32>
    %326 = arith.addf %324, %325 : vector<2x16xf32>
    %cst_43 = arith.constant 0.000000e+00 : f32
    %327 = vector.broadcast %cst_43 : f32 to vector<2x16xf32>
    %328 = arith.maximumf %326, %327 : vector<2x16xf32>
    %cst_44 = arith.constant dense<0.000000e+00> : vector<2x4xf32>
    %329 = tpu.matmul %328, %6, %cst_44 {dimension_numbers = #tpu.dot_dimension_numbers<[1], [0], [0], [1], [0, 0, 1, 1], [], []>} : vector<2x16xf32>, vector<16x4xf32>, vector<2x4xf32> -> vector<2x4xf32>
    %330 = vector.broadcast %9 : vector<1x4xf32> to vector<2x4xf32>
    %331 = arith.addf %329, %330 : vector<2x4xf32>
    %cst_45 = arith.constant dense<0xFF800000> : vector<2xf32>
    %332 = vector.multi_reduction <maximumf>, %331, %cst_45 [1] : vector<2x4xf32> to vector<2xf32>
    %333 = vector.shape_cast %332 : vector<2xf32> to vector<2x1xf32>
    %334 = vector.broadcast %333 : vector<2x1xf32> to vector<2x4xf32>
    %335 = arith.subf %331, %334 : vector<2x4xf32>
    %336 = math.exp %335 : vector<2x4xf32>
    %cst_46 = arith.constant dense<0.000000e+00> : vector<2xf32>
    %337 = vector.multi_reduction <add>, %336, %cst_46 [1] : vector<2x4xf32> to vector<2xf32>
    %338 = vector.shape_cast %337 : vector<2xf32> to vector<2x1xf32>
    %339 = vector.broadcast %338 : vector<2x1xf32> to vector<2x4xf32>
    %340 = arith.divf %336, %339 : vector<2x4xf32>
    %c0_47 = arith.constant 0 : index
    %c0_48 = arith.constant 0 : index
    %341 = vector.load %arg2[%c0_47, %c0_48] : memref<2x4xf32, #tpu.memory_space<vmem>>, vector<2x4xf32>
    tpu.vector_store %arg2[%c0_47, %c0_48], %340 {strides = array<i32>} : memref<2x4xf32, #tpu.memory_space<vmem>>, vector<2x4xf32>,
    return
  }
}

</mosaic_0001>

<bundles_post_ra>
// kernel: forward.1
= control target key start
LH: loop header
LB: loop body
LE: loop exit
PB: predicated region body
PF: predicated region fallthrough
CT: control target
= control target key end

     0   :  { %7 = vsyncpa [#allocation3], 0  ;;  %s2127_s0 = inlined_call_operand.vmem [shape: f32[16,8], index: 0, kind: input, shape index: {}]   ;;  %s2128_s1 = inlined_call_operand.hbm [shape: f32[152,256], index: 1, kind: input, shape index: {}]   ;;  %s2129_s2 = inlined_call_operand.hbm [shape: f32[2,4], index: 2, kind: output, shape index: {}]  }
   0x1   :  { %8 = vsyncpa [#allocation4], 0  ;;  %s1868_s9 = smov [#allocation2]   ;;  %s1820_s13 = scalar_lea.hbm %s2128_s1, 4864 }
   0x2   :  { %s16_s10 = sshll.u32 %s1868_s9, 4  ;;  %p1821_p0 = scmp.ne.s32.totalorder %s2128_s1, %s1820_s13  ;;  %s17_s10 = int_to_ptr.vmem [resolvable:$true] %s16_s10 }
   0x3   :  { %p1824_p1 = scmp.lt.u32.totalorder %s1820_s13, %s2128_s1 }
   0x5   :  { %p1826_p2 = pnand %p1824_p1, %p1821_p0 }
   0x7   :  { %1829 = shalt.err (!%p1826_p2)
}
   0x8   :  { %s1830_s18 = scalar_lea.vmem %s17_s10, 4864  ;;  %p1835_p4 = scmp.lt.s32.totalorder %s17_s10, %s17_s10 }
   0x9   :  { %p1831_p3 = scmp.ne.s32.totalorder %s17_s10, %s1830_s18  ;;  %p1836_p5 = scmp.lt.s32.totalorder %s1830_s18, %s1830_s18 }
   0xb   :  { %p1837_p6 = por %p1836_p5, %p1835_p4 }
   0xd   :  { %p1838_p7 = pnand %p1837_p6, %p1831_p3 }
   0xf   :  { %1841 = shalt.err (!%p1838_p7)
}
  0x10   :  { %s1869_s19 = smov 256   ;;  %s1870_s20 = smov 16  }
  0x11   :  { %22 = dma.hbm_to_vmem [thread:$0]  %s2128_s1, 4864, %s17_s10, [#allocation3], %s1869_s19, %s1869_s19, %s1870_s20  }
  0x12   :  { %1864 = dma.done.wait [#allocation3], 4864  }
  0x13   :  { %1865 = vsyncadd [#allocation3], 4294962432  ;;  %vm58_vm0 = vcmask 64512   ;;  %v42_v0 = vld [vmem:[#allocation2 + $0x80] sm:$0xff]  ;;  %v57_v2 = vld [vmem:[%s2127_s0 + $0x8] sm:$0xff]  ;;  %s1871_s1 = smov 64  }
  0x14   :  { %v56_v1 = vld [vmem:[%s2127_s0] sm:$0xff]  ;;  %1509 = vmatprep.subr.mxu0 %v42_v0  ;;  %v43_v3 = vld [vmem:[#allocation2 + $0x90] ss:$0 sm:$0xff]  ;;  %s1872_s0 = smov 32   ;;  %v27_v18 = vld [vmem:[#allocation2 + $0x8] sm:$0xff]  ;;  %v1873_v43 = vmov 0.0  }
  0x15   :  { %1511 = vmatprep.mubr.msk.f32.mxu0 %vm58_vm0, %v56_v1  ;;  %1510 = vmatpush3.msra.mxu0 %v42_v0  ;;  %v29_v19 = vld [vmem:[#allocation2 + $0x18] sm:$0xff]  ;;  %v26_v20 = vld [vmem:[#allocation2] sm:$0xff]  ;;  %v28_v22 = vld [vmem:[#allocation2 + $0x10] sm:$0xff]  ;;  %vm168_vm1 = vcmask 261120   ;;  %vm170_vm2 = vcmask 523264   ;;  %vm1875_vm3 = vmmov 0  }
  0x16   :  { %1512 = vmatmul.mubr.msk.f32.vlgmr.msra.gmra.mrb[0].mxu0 %vm58_vm0, %v57_v2  ;;  %v1921_v21 = vpack.c.bf16 %v29_v19, %v27_v18  ;;  %v31_v23 = vld [vmem:[#allocation2 + $0x28] sm:$0xff]  ;;  %v33_v24 = vld [vmem:[#allocation2 + $0x38] sm:$0xff]  ;;  %v1923_v25 = vpack.c.bf16 %v28_v22, %v26_v20  ;;  %v30_v27 = vld [vmem:[#allocation2 + $0x20] sm:$0xff]  ;;  %238 = vmatprep.mubr.f32.mxu1 %v1873_v43  ;;  %vm1290_vm4 = vcmask 130048   ;;  %vm1438_vm5 = vcmask 25600   ;;  %s1876_s27 = smov [#allocation5]  }
  0x17   :  { %v1925_v26 = vpack.c.bf16 %v33_v24, %v31_v23  ;;  %v32_v28 = vld [vmem:[#allocation2 + $0x30] sm:$0xff]  ;;  %v35_v29 = vld [vmem:[#allocation2 + $0x48] sm:$0xff]  ;;  %v37_v30 = vld [vmem:[#allocation2 + $0x58] sm:$0xff]  ;;  %374 = vmatprep.mubr.f32.mxu0 %v1873_v43  ;;  %s1457_s28 = sshll.u32 %s1876_s27, 4  ;;  %s1458_s28 = int_to_ptr.vmem [resolvable:$true] %s1457_s28 }
  0x18   :  { %1540 = vmatprep.subr.bf16.mxu1 %v1921_v21  ;;  %1556 = vmatprep.subr.bf16.mxu0 %v1921_v21  ;;  %v1930_v31 = vpack.c.bf16 %v32_v28, %v30_v27  ;;  %v1934_v32 = vpack.c.bf16 %v37_v30, %v35_v29  ;;  %v34_v33 = vld [vmem:[#allocation2 + $0x40] sm:$0xff]  ;;  %v36_v34 = vld [vmem:[#allocation2 + $0x50] sm:$0xff]  ;;  %v39_v35 = vld [vmem:[#allocation2 + $0x68] sm:$0xff]  ;;  %s1842_s29 = scalar_lea.vmem %s1458_s28, 32  ;;  %p1847_p9 = scmp.lt.s32.totalorder %s1458_s28, %s1458_s28 }
  0x19   :  { %1542 = vmatpush1.bf16.msra.mxu1 %v1923_v25  ;;  %1558 = vmatpush1.bf16.msra.mxu0 %v1923_v25  ;;  %v41_v36 = vld [vmem:[#allocation2 + $0x78] sm:$0xff]  ;;  %v1938_v37 = vpack.c.bf16 %v36_v34, %v34_v33  ;;  %v38_v39 = vld [vmem:[#allocation2 + $0x60] sm:$0xff]  ;;  %v40_v40 = vld [vmem:[#allocation2 + $0x70] sm:$0xff]  ;;  %p1843_p8 = scmp.ne.s32.totalorder %s1458_s28, %s1842_s29  ;;  %p1848_p10 = scmp.lt.s32.totalorder %s1842_s29, %s1842_s29 }
  0x1a   :  { %1544 = vmatprep.subr.bf16.mxu1 %v1925_v26  ;;  %1560 = vmatprep.subr.bf16.mxu0 %v1925_v26  ;;  %v1942_v38 = vpack.c.bf16 %v41_v36, %v39_v35  ;;  %v1947_v42 = vpack.c.bf16 %v40_v40, %v38_v39  ;;  %v1971_v49 = vld [vmem:[#allocation2 + $0x98] ss:$0 sm:$0xff] }
  0x1b   :  { %p1849_p11 = por %p1848_p10, %p1847_p9 }
  0x1d   :  { %1546 = vmatpush1.bf16.msra.mxu1 %v1930_v31  ;;  %1562 = vmatpush1.bf16.msra.mxu0 %v1930_v31  ;;  %p1850_p12 = pnand %p1849_p11, %p1843_p8 }
  0x1e   :  { %1548 = vmatprep.subr.bf16.mxu1 %v1934_v32  ;;  %1564 = vmatprep.subr.bf16.mxu0 %v1934_v32 }
  0x21   :  { %1550 = vmatpush1.bf16.msra.mxu1 %v1938_v37  ;;  %1566 = vmatpush1.bf16.msra.mxu0 %v1938_v37 }
  0x22   :  { %1552 = vmatprep.subr.bf16.mxu1 %v1942_v38  ;;  %1568 = vmatprep.subr.bf16.mxu0 %v1942_v38 }
  0x25   :  { %1554 = vmatpush1.bf16.msra.mxu1 %v1947_v42  ;;  %1570 = vmatpush1.bf16.msra.mxu0 %v1947_v42 }
  0x26   :  { %1572 = vmatprep.subr.bf16.mxu1 %v1921_v21  ;;  %1588 = vmatprep.subr.bf16.mxu0 %v1921_v21 }
  0xe9   :  { %v1513_v4 = vpop.f32.mrb[0].mxu0 }
  0xea   :  { %v1910_v5 = vadd.f32 %v1513_v4, %v43_v3  ;;  %v131_v6 = vpop.f32.mrb[1].mxu0 }
  0xeb   :  { %v1912_v7 = vadd.f32 %v131_v6, %v43_v3 }
  0xed   :  { %1688 = vtanh.f32 %v1912_v7  ;;  %v1468_v9 = vmul.f32 -1.442695, %v1912_v7  ;;  %v271_v48 = vrot.slane %v1912_v7, 2  ;;  %v406_v22 = vrot.slane %v1912_v7, 4 }
  0xef   :  { %1690 = vpow2.f32 %v1468_v9 }
  0xf7   :  { %v1689_v8 = vpop.eup %1688 }
  0xf8   :  { %149 = vrot.lane.b32.xlu0 %v1689_v8, %s1871_s1 }
  0xf9   :  { %v1691_v10 = vpop.eup %1690 }
  0xfa   :  { %v143_v11 = vadd.f32 1.0, %v1691_v10 }
  0xfc   :  { %1692 = vrcp.f32 %v143_v11 }
 0x106   :  { %v1693_v12 = vpop.eup %1692 }
 0x107   :  { %v147_v15 = vmul.f32 0.0, %v1693_v12 }
 0x16a   :  { %v150_v13 = vpop.permute.xlu0 %149 }
 0x16b   :  { %v152_v14 = vmul.f32 %v1693_v12, %v150_v13 }
 0x16d   :  { %154 = vrot.lane.b32.xlu0 %v152_v14, %s1872_s0 }
 0x1df   :  { %v155_v16 = vpop.permute.xlu0 %154 }
 0x1e0   :  { %v1918_v17 = vadd.f32 %v155_v16, %v147_v15 }
 0x1e2   :  { %1694 = vtanh.f32 %v1918_v17 }
 0x1ec   :  { %v1695_v41 = vpop.eup %1694 }
 0x1ed   :  { %160 = vrot.lane.b32.xlu1 %v1695_v41, %s1871_s1 }
 0x25f   :  { %v161_v44 = vpop.permute.xlu1 %160 }
 0x260   :  { %v163_v45 = vmul.f32 %v1693_v12, %v161_v44 }
 0x262   :  { %165 = vrot.lane.b32.xlu1 %v163_v45, %s1872_s0 }
 0x2d4   :  { %v166_v46 = vpop.permute.xlu1 %165 }
 0x2d5   :  { %v169_v47 = vsel %vm168_vm1, %v166_v46, 0.0 }
 0x2d6   :  { %1469 = vmatmul.mubr.msk.f32.vlgmr.msra.gmra.mrb[0].mxu1 %vm170_vm2, %v169_v47 }
 0x2d7   :  { %1574 = vmatpush1.bf16.msra.mxu1 %v1923_v25  ;;  %509 = vmatprep.mubr.f32.mxu1 %v1873_v43 }
 0x2d8   :  { %1576 = vmatprep.subr.bf16.mxu1 %v1925_v26 }
 0x2db   :  { %1578 = vmatpush1.bf16.msra.mxu1 %v1930_v31 }
 0x2dc   :  { %1580 = vmatprep.subr.bf16.mxu1 %v1934_v32 }
 0x2df   :  { %1582 = vmatpush1.bf16.msra.mxu1 %v1938_v37 }
 0x2e0   :  { %1584 = vmatprep.subr.bf16.mxu1 %v1942_v38 }
 0x2e3   :  { %1586 = vmatpush1.bf16.msra.mxu1 %v1947_v42 }
 0x2e4   :  { %1604 = vmatprep.subr.bf16.mxu1 %v1921_v21 }
 0x3a9   :  { %v240_v50 = vpop.f32.mrb[0].mxu1 }
 0x3aa   :  { %v273_v51 = vadd.f32 %v271_v48, %v240_v50  ;;  %v242_v52 = vpop.f32.mrb[1].mxu1 }
 0x3ab   :  { %v245_v53 = vadd.f32 %v242_v52, %v1971_v49 }
 0x3ac   :  { %1696 = vtanh.f32 %v273_v51  ;;  %v1471_v56 = vmul.f32 -1.442695, %v273_v51 }
 0x3ad   :  { %1698 = vtanh.f32 %v245_v53  ;;  %v1470_v57 = vmul.f32 -1.442695, %v245_v53 }
 0x3ae   :  { %1700 = vpow2.f32 %v1471_v56 }
 0x3af   :  { %1702 = vpow2.f32 %v1470_v57 }
 0x3b6   :  { %v1697_v54 = vpop.eup %1696 }
 0x3b7   :  { %v1699_v55 = vpop.eup %1698  ;;  %283 = vrot.lane.b32.xlu1 %v1697_v54, %s1871_s1 }
 0x3b8   :  { %255 = vrot.lane.b32.xlu0 %v1699_v55, %s1871_s1  ;;  %v1701_v58 = vpop.eup %1700 }
 0x3b9   :  { %v1703_v59 = vpop.eup %1702  ;;  %v277_v60 = vadd.f32 1.0, %v1701_v58 }
 0x3ba   :  { %v249_v61 = vadd.f32 1.0, %v1703_v59 }
 0x3bb   :  { %1704 = vrcp.f32 %v277_v60 }
 0x3bc   :  { %1706 = vrcp.f32 %v249_v61 }
 0x3c5   :  { %v1705_v62 = vpop.eup %1704 }
 0x3c6   :  { %v1707_v0 = vpop.eup %1706  ;;  %v281_v4 = vmul.f32 %v1705_v62, %v1918_v17 }
 0x3c7   :  { %v253_v8 = vmul.f32 0.0, %v1707_v0 }
 0x429   :  { %v284_v63 = vpop.permute.xlu1 %283 }
 0x42a   :  { %v286_v1 = vmul.f32 %v1705_v62, %v284_v63  ;;  %v256_v2 = vpop.permute.xlu0 %255 }
 0x42b   :  { %v258_v3 = vmul.f32 %v1707_v0, %v256_v2 }
 0x42c   :  { %288 = vrot.lane.b32.xlu1 %v286_v1, %s1872_s0  ;;  %v541_v1 = vrot.slane %v1912_v7, 6 }
 0x42d   :  { %260 = vrot.lane.b32.xlu0 %v258_v3, %s1872_s0 }
 0x49e   :  { %v289_v6 = vpop.permute.xlu1 %288 }
 0x49f   :  { %v291_v9 = vadd.f32 %v289_v6, %v281_v4  ;;  %v261_v10 = vpop.permute.xlu0 %260 }
 0x4a0   :  { %v263_v11 = vadd.f32 %v261_v10, %v253_v8 }
 0x4a1   :  { %1708 = vtanh.f32 %v291_v9 }
 0x4a2   :  { %1710 = vtanh.f32 %v263_v11 }
 0x4ab   :  { %v1709_v12 = vpop.eup %1708 }
 0x4ac   :  { %v1711_v13 = vpop.eup %1710  ;;  %294 = vrot.lane.b32.xlu1 %v1709_v12, %s1871_s1 }
 0x4ad   :  { %266 = vrot.lane.b32.xlu0 %v1711_v13, %s1871_s1 }
 0x51e   :  { %v295_v14 = vpop.permute.xlu1 %294 }
 0x51f   :  { %v297_v15 = vmul.f32 %v1705_v62, %v295_v14  ;;  %v267_v16 = vpop.permute.xlu0 %266 }
 0x520   :  { %v269_v18 = vmul.f32 %v1707_v0, %v267_v16 }
 0x521   :  { %299 = vrot.lane.b32.xlu0 %v297_v15, %s1872_s0 }
 0x522   :  { %303 = vrot.lane.b32.xlu1 %v269_v18, %s1871_s1 }
 0x593   :  { %v300_v17 = vpop.permute.xlu0 %299 }
 0x594   :  { %v304_v19 = vpop.permute.xlu1 %303 }
 0x595   :  { %v306_v20 = vsel %vm168_vm1, %v300_v17, %v304_v19 }
 0x596   :  { %1472 = vmatmul.mubr.msk.f32.vlgmr.msra.gmra.mrb[2].mxu0 %vm170_vm2, %v306_v20 }
 0x597   :  { %1590 = vmatpush1.bf16.msra.mxu0 %v1923_v25  ;;  %644 = vmatprep.mubr.f32.mxu0 %v1873_v43 }
 0x598   :  { %1592 = vmatprep.subr.bf16.mxu0 %v1925_v26 }
 0x59b   :  { %1594 = vmatpush1.bf16.msra.mxu0 %v1930_v31 }
 0x59c   :  { %1596 = vmatprep.subr.bf16.mxu0 %v1934_v32 }
 0x59f   :  { %1598 = vmatpush1.bf16.msra.mxu0 %v1938_v37 }
 0x5a0   :  { %1600 = vmatprep.subr.bf16.mxu0 %v1942_v38 }
 0x5a3   :  { %1602 = vmatpush1.bf16.msra.mxu0 %v1947_v42 }
 0x5a4   :  { %1620 = vmatprep.subr.bf16.mxu0 %v1921_v21 }
 0x669   :  { %v376_v23 = vpop.f32.mrb[2].mxu0 }
 0x66a   :  { %v408_v24 = vadd.f32 %v406_v22, %v376_v23  ;;  %v378_v27 = vpop.f32.mrb[3].mxu0 }
 0x66b   :  { %v381_v28 = vadd.f32 %v378_v27, %v1971_v49 }
 0x66c   :  { %1712 = vtanh.f32 %v408_v24  ;;  %v1474_v33 = vmul.f32 -1.442695, %v408_v24 }
 0x66d   :  { %1714 = vtanh.f32 %v381_v28  ;;  %v1473_v34 = vmul.f32 -1.442695, %v381_v28 }
 0x66e   :  { %1716 = vpow2.f32 %v1474_v33 }
 0x66f   :  { %1718 = vpow2.f32 %v1473_v34 }
 0x676   :  { %v1713_v29 = vpop.eup %1712 }
 0x677   :  { %v1715_v30 = vpop.eup %1714  ;;  %418 = vrot.lane.b32.xlu1 %v1713_v29, %s1871_s1 }
 0x678   :  { %391 = vrot.lane.b32.xlu0 %v1715_v30, %s1871_s1  ;;  %v1717_v35 = vpop.eup %1716 }
 0x679   :  { %v1719_v36 = vpop.eup %1718  ;;  %v412_v39 = vadd.f32 1.0, %v1717_v35 }
 0x67a   :  { %v385_v40 = vadd.f32 1.0, %v1719_v36 }
 0x67b   :  { %1720 = vrcp.f32 %v412_v39 }
 0x67c   :  { %1722 = vrcp.f32 %v385_v40 }
 0x685   :  { %v1721_v41 = vpop.eup %1720 }
 0x686   :  { %v1723_v45 = vpop.eup %1722  ;;  %v416_v50 = vmul.f32 %v1721_v41, %v291_v9 }
 0x687   :  { %v389_v52 = vmul.f32 %v1723_v45, %v263_v11 }
 0x6e9   :  { %v419_v44 = vpop.permute.xlu1 %418 }
 0x6ea   :  { %v421_v46 = vmul.f32 %v1721_v41, %v419_v44  ;;  %v392_v47 = vpop.permute.xlu0 %391 }
 0x6eb   :  { %v394_v48 = vmul.f32 %v1723_v45, %v392_v47 }
 0x6ec   :  { %423 = vrot.lane.b32.xlu1 %v421_v46, %s1872_s0 }
 0x6ed   :  { %396 = vrot.lane.b32.xlu0 %v394_v48, %s1872_s0 }
 0x75e   :  { %v424_v51 = vpop.permute.xlu1 %423 }
 0x75f   :  { %v426_v53 = vadd.f32 %v424_v51, %v416_v50  ;;  %v397_v54 = vpop.permute.xlu0 %396 }
 0x760   :  { %v399_v55 = vadd.f32 %v397_v54, %v389_v52 }
 0x761   :  { %1724 = vtanh.f32 %v426_v53 }
 0x762   :  { %1726 = vtanh.f32 %v399_v55 }
 0x76b   :  { %v1725_v56 = vpop.eup %1724 }
 0x76c   :  { %v1727_v57 = vpop.eup %1726  ;;  %429 = vrot.lane.b32.xlu1 %v1725_v56, %s1871_s1 }
 0x76d   :  { %402 = vrot.lane.b32.xlu0 %v1727_v57, %s1871_s1 }
 0x7de   :  { %v430_v58 = vpop.permute.xlu1 %429 }
 0x7df   :  { %v432_v59 = vmul.f32 %v1721_v41, %v430_v58  ;;  %v403_v60 = vpop.permute.xlu0 %402 }
 0x7e0   :  { %v405_v61 = vmul.f32 %v1723_v45, %v403_v60 }
 0x7e1   :  { %434 = vrot.lane.b32.xlu0 %v432_v59, %s1872_s0 }
 0x7e2   :  { %438 = vrot.lane.b32.xlu1 %v405_v61, %s1871_s1 }
 0x853   :  { %v435_v62 = vpop.permute.xlu0 %434 }
 0x854   :  { %v439_v63 = vpop.permute.xlu1 %438 }
 0x855   :  { %v441_v0 = vsel %vm168_vm1, %v435_v62, %v439_v63 }
 0x856   :  { %1475 = vmatmul.mubr.msk.f32.vlgmr.msra.gmra.mrb[2].mxu1 %vm170_vm2, %v441_v0 }
 0x857   :  { %1606 = vmatpush1.bf16.msra.mxu1 %v1923_v25  ;;  %777 = vmatprep.mubr.f32.mxu1 %v1873_v43 }
 0x858   :  { %1608 = vmatprep.subr.bf16.mxu1 %v1925_v26 }
 0x85b   :  { %1610 = vmatpush1.bf16.msra.mxu1 %v1930_v31 }
 0x85c   :  { %1612 = vmatprep.subr.bf16.mxu1 %v1934_v32 }
 0x85f   :  { %1614 = vmatpush1.bf16.msra.mxu1 %v1938_v37 }
 0x860   :  { %1616 = vmatprep.subr.bf16.mxu1 %v1942_v38 }
 0x863   :  { %1618 = vmatpush1.bf16.msra.mxu1 %v1947_v42 }
 0x864   :  { %1636 = vmatprep.subr.bf16.mxu1 %v1921_v21 }
 0x929   :  { %v511_v2 = vpop.f32.mrb[2].mxu1 }
 0x92a   :  { %v543_v3 = vadd.f32 %v541_v1, %v511_v2  ;;  %v513_v4 = vpop.f32.mrb[3].mxu1 }
 0x92b   :  { %v516_v6 = vadd.f32 %v513_v4, %v1971_v49 }
 0x92c   :  { %1728 = vtanh.f32 %v543_v3  ;;  %v1477_v10 = vmul.f32 -1.442695, %v543_v3 }
 0x92d   :  { %1730 = vtanh.f32 %v516_v6  ;;  %v1476_v11 = vmul.f32 -1.442695, %v516_v6 }
 0x92e   :  { %1732 = vpow2.f32 %v1477_v10 }
 0x92f   :  { %1734 = vpow2.f32 %v1476_v11 }
 0x936   :  { %v1729_v8 = vpop.eup %1728 }
 0x937   :  { %v1731_v9 = vpop.eup %1730  ;;  %553 = vrot.lane.b32.xlu1 %v1729_v8, %s1871_s1 }
 0x938   :  { %526 = vrot.lane.b32.xlu0 %v1731_v9, %s1871_s1  ;;  %v1733_v12 = vpop.eup %1732 }
 0x939   :  { %v1735_v13 = vpop.eup %1734  ;;  %v547_v7 = vadd.f32 1.0, %v1733_v12 }
 0x93a   :  { %v520_v14 = vadd.f32 1.0, %v1735_v13 }
 0x93b   :  { %1736 = vrcp.f32 %v547_v7 }
 0x93c   :  { %1738 = vrcp.f32 %v520_v14 }
 0x945   :  { %v1737_v15 = vpop.eup %1736 }
 0x946   :  { %v1739_v18 = vpop.eup %1738  ;;  %v551_v22 = vmul.f32 %v1737_v15, %v426_v53 }
 0x947   :  { %v524_v24 = vmul.f32 %v1739_v18, %v399_v55 }
 0x9a9   :  { %v554_v16 = vpop.permute.xlu1 %553 }
 0x9aa   :  { %v556_v17 = vmul.f32 %v1737_v15, %v554_v16  ;;  %v527_v19 = vpop.permute.xlu0 %526 }
 0x9ab   :  { %v529_v20 = vmul.f32 %v1739_v18, %v527_v19 }
 0x9ac   :  { %558 = vrot.lane.b32.xlu1 %v556_v17, %s1872_s0 }
 0x9ad   :  { %531 = vrot.lane.b32.xlu0 %v529_v20, %s1872_s0 }
 0xa1e   :  { %v559_v23 = vpop.permute.xlu1 %558 }
 0xa1f   :  { %v561_v27 = vadd.f32 %v559_v23, %v551_v22  ;;  %v532_v28 = vpop.permute.xlu0 %531 }
 0xa20   :  { %v534_v29 = vadd.f32 %v532_v28, %v524_v24 }
 0xa21   :  { %1740 = vtanh.f32 %v561_v27 }
 0xa22   :  { %1742 = vtanh.f32 %v534_v29 }
 0xa2b   :  { %v1741_v30 = vpop.eup %1740 }
 0xa2c   :  { %v1743_v33 = vpop.eup %1742  ;;  %564 = vrot.lane.b32.xlu1 %v1741_v30, %s1871_s1 }
 0xa2d   :  { %537 = vrot.lane.b32.xlu0 %v1743_v33, %s1871_s1 }
 0xa9e   :  { %v565_v34 = vpop.permute.xlu1 %564 }
 0xa9f   :  { %v567_v35 = vmul.f32 %v1737_v15, %v565_v34  ;;  %v538_v36 = vpop.permute.xlu0 %537  ;;  %v810_v15 = vrot.slane %v1910_v5, 2 }
 0xaa0   :  { %v540_v39 = vmul.f32 %v1739_v18, %v538_v36 }
 0xaa1   :  { %569 = vrot.lane.b32.xlu0 %v567_v35, %s1872_s0 }
 0xaa2   :  { %573 = vrot.lane.b32.xlu1 %v540_v39, %s1871_s1 }
 0xb13   :  { %v570_v40 = vpop.permute.xlu0 %569 }
 0xb14   :  { %v574_v41 = vpop.permute.xlu1 %573 }
 0xb15   :  { %v576_v44 = vsel %vm168_vm1, %v570_v40, %v574_v41 }
 0xb16   :  { %1478 = vmatmul.mubr.msk.f32.vlgmr.msra.gmra.mrb[4].mxu0 %vm170_vm2, %v576_v44 }
 0xb17   :  { %1622 = vmatpush1.bf16.msra.mxu0 %v1923_v25  ;;  %913 = vmatprep.mubr.f32.mxu0 %v1873_v43 }
 0xb18   :  { %1624 = vmatprep.subr.bf16.mxu0 %v1925_v26 }
 0xb1b   :  { %1626 = vmatpush1.bf16.msra.mxu0 %v1930_v31 }
 0xb1c   :  { %1628 = vmatprep.subr.bf16.mxu0 %v1934_v32 }
 0xb1f   :  { %1630 = vmatpush1.bf16.msra.mxu0 %v1938_v37 }
 0xb20   :  { %1632 = vmatprep.subr.bf16.mxu0 %v1942_v38 }
 0xb23   :  { %1634 = vmatpush1.bf16.msra.mxu0 %v1947_v42 }
 0xb24   :  { %1652 = vmatprep.subr.bf16.mxu0 %v1921_v21 }
 0xbe9   :  { %v646_v45 = vpop.f32.mrb[4].mxu0 }
 0xbea   :  { %v676_v46 = vadd.f32 %v646_v45, %v1910_v5  ;;  %v648_v47 = vpop.f32.mrb[5].mxu0 }
 0xbeb   :  { %v651_v48 = vadd.f32 %v648_v47, %v1971_v49 }
 0xbec   :  { %1744 = vtanh.f32 %v676_v46  ;;  %v1480_v52 = vmul.f32 -1.442695, %v676_v46 }
 0xbed   :  { %1746 = vtanh.f32 %v651_v48  ;;  %v1479_v53 = vmul.f32 -1.442695, %v651_v48 }
 0xbee   :  { %1748 = vpow2.f32 %v1480_v52 }
 0xbef   :  { %1750 = vpow2.f32 %v1479_v53 }
 0xbf6   :  { %v1745_v50 = vpop.eup %1744 }
 0xbf7   :  { %v1747_v51 = vpop.eup %1746  ;;  %686 = vrot.lane.b32.xlu1 %v1745_v50, %s1871_s1 }
 0xbf8   :  { %661 = vrot.lane.b32.xlu0 %v1747_v51, %s1871_s1  ;;  %v1749_v54 = vpop.eup %1748 }
 0xbf9   :  { %v1751_v21 = vpop.eup %1750  ;;  %v680_v55 = vadd.f32 1.0, %v1749_v54 }
 0xbfa   :  { %v655_v56 = vadd.f32 1.0, %v1751_v21 }
 0xbfb   :  { %1752 = vrcp.f32 %v680_v55 }
 0xbfc   :  { %1754 = vrcp.f32 %v655_v56 }
 0xc05   :  { %v1753_v57 = vpop.eup %1752 }
 0xc06   :  { %v1755_v59 = vpop.eup %1754  ;;  %v684_v63 = vmul.f32 %v1753_v57, %v561_v27 }
 0xc07   :  { %v659_v1 = vmul.f32 %v1755_v59, %v534_v29 }
 0xc69   :  { %v687_v58 = vpop.permute.xlu1 %686 }
 0xc6a   :  { %v689_v60 = vmul.f32 %v1753_v57, %v687_v58  ;;  %v662_v61 = vpop.permute.xlu0 %661  ;;  %v945_v58 = vrot.slane %v1910_v5, 4 }
 0xc6b   :  { %v664_v62 = vmul.f32 %v1755_v59, %v662_v61 }
 0xc6c   :  { %691 = vrot.lane.b32.xlu1 %v689_v60, %s1872_s0 }
 0xc6d   :  { %666 = vrot.lane.b32.xlu0 %v664_v62, %s1872_s0 }
 0xcde   :  { %v692_v0 = vpop.permute.xlu1 %691 }
 0xcdf   :  { %v694_v2 = vadd.f32 %v692_v0, %v684_v63  ;;  %v667_v3 = vpop.permute.xlu0 %666 }
 0xce0   :  { %v669_v4 = vadd.f32 %v667_v3, %v659_v1 }
 0xce1   :  { %1756 = vtanh.f32 %v694_v2 }
 0xce2   :  { %1758 = vtanh.f32 %v669_v4 }
 0xceb   :  { %v1757_v6 = vpop.eup %1756 }
 0xcec   :  { %v1759_v8 = vpop.eup %1758  ;;  %697 = vrot.lane.b32.xlu1 %v1757_v6, %s1871_s1 }
 0xced   :  { %672 = vrot.lane.b32.xlu0 %v1759_v8, %s1871_s1 }
 0xd5e   :  { %v698_v9 = vpop.permute.xlu1 %697 }
 0xd5f   :  { %v700_v10 = vmul.f32 %v1753_v57, %v698_v9  ;;  %v673_v11 = vpop.permute.xlu0 %672 }
 0xd60   :  { %v675_v12 = vmul.f32 %v1755_v59, %v673_v11 }
 0xd61   :  { %702 = vrot.lane.b32.xlu0 %v700_v10, %s1872_s0 }
 0xd62   :  { %706 = vrot.lane.b32.xlu1 %v675_v12, %s1871_s1 }
 0xdd3   :  { %v703_v13 = vpop.permute.xlu0 %702 }
 0xdd4   :  { %v707_v7 = vpop.permute.xlu1 %706 }
 0xdd5   :  { %v709_v14 = vsel %vm168_vm1, %v703_v13, %v707_v7 }
 0xdd6   :  { %1481 = vmatmul.mubr.msk.f32.vlgmr.msra.gmra.mrb[4].mxu1 %vm170_vm2, %v709_v14 }
 0xdd7   :  { %1638 = vmatpush1.bf16.msra.mxu1 %v1923_v25  ;;  %1048 = vmatprep.mubr.f32.mxu1 %v1873_v43 }
 0xdd8   :  { %1640 = vmatprep.subr.bf16.mxu1 %v1925_v26 }
 0xddb   :  { %1642 = vmatpush1.bf16.msra.mxu1 %v1930_v31 }
 0xddc   :  { %1644 = vmatprep.subr.bf16.mxu1 %v1934_v32 }
 0xddf   :  { %1646 = vmatpush1.bf16.msra.mxu1 %v1938_v37 }
 0xde0   :  { %1648 = vmatprep.subr.bf16.mxu1 %v1942_v38 }
 0xde3   :  { %1650 = vmatpush1.bf16.msra.mxu1 %v1947_v42 }
 0xea9   :  { %v779_v16 = vpop.f32.mrb[4].mxu1 }
 0xeaa   :  { %v812_v18 = vadd.f32 %v810_v15, %v779_v16  ;;  %v781_v17 = vpop.f32.mrb[5].mxu1 }
 0xeab   :  { %v784_v19 = vadd.f32 %v781_v17, %v1971_v49 }
 0xeac   :  { %1760 = vtanh.f32 %v812_v18  ;;  %v1483_v23 = vmul.f32 -1.442695, %v812_v18 }
 0xead   :  { %1762 = vtanh.f32 %v784_v19  ;;  %v1482_v24 = vmul.f32 -1.442695, %v784_v19 }
 0xeae   :  { %1764 = vpow2.f32 %v1483_v23  ;;  %v1080_v23 = vrot.slane %v1910_v5, 6 }
 0xeaf   :  { %1766 = vpow2.f32 %v1482_v24 }
 0xeb6   :  { %v1761_v20 = vpop.eup %1760 }
 0xeb7   :  { %v1763_v22 = vpop.eup %1762  ;;  %822 = vrot.lane.b32.xlu1 %v1761_v20, %s1871_s1 }
 0xeb8   :  { %794 = vrot.lane.b32.xlu0 %v1763_v22, %s1871_s1  ;;  %v1765_v27 = vpop.eup %1764 }
 0xeb9   :  { %v1767_v28 = vpop.eup %1766  ;;  %v816_v29 = vadd.f32 1.0, %v1765_v27 }
 0xeba   :  { %v788_v30 = vadd.f32 1.0, %v1767_v28 }
 0xebb   :  { %1768 = vrcp.f32 %v816_v29 }
 0xebc   :  { %1770 = vrcp.f32 %v788_v30 }
 0xec5   :  { %v1769_v33 = vpop.eup %1768 }
 0xec6   :  { %v1771_v35 = vpop.eup %1770  ;;  %v820_v41 = vmul.f32 %v1769_v33, %v694_v2 }
 0xec7   :  { %v792_v45 = vmul.f32 %v1771_v35, %v669_v4 }
 0xf29   :  { %v823_v34 = vpop.permute.xlu1 %822 }
 0xf2a   :  { %v825_v36 = vmul.f32 %v1769_v33, %v823_v34  ;;  %v795_v39 = vpop.permute.xlu0 %794 }
 0xf2b   :  { %v797_v40 = vmul.f32 %v1771_v35, %v795_v39 }
 0xf2c   :  { %827 = vrot.lane.b32.xlu1 %v825_v36, %s1872_s0 }
 0xf2d   :  { %799 = vrot.lane.b32.xlu0 %v797_v40, %s1872_s0 }
 0xf9e   :  { %v828_v44 = vpop.permute.xlu1 %827 }
 0xf9f   :  { %v830_v46 = vadd.f32 %v828_v44, %v820_v41  ;;  %v800_v47 = vpop.permute.xlu0 %799 }
 0xfa0   :  { %v802_v48 = vadd.f32 %v800_v47, %v792_v45 }
 0xfa1   :  { %1772 = vtanh.f32 %v830_v46 }
 0xfa2   :  { %1774 = vtanh.f32 %v802_v48 }
 0xfab   :  { %v1773_v50 = vpop.eup %1772 }
 0xfac   :  { %v1775_v51 = vpop.eup %1774  ;;  %833 = vrot.lane.b32.xlu1 %v1773_v50, %s1871_s1 }
 0xfad   :  { %805 = vrot.lane.b32.xlu0 %v1775_v51, %s1871_s1 }
0x101e   :  { %v834_v52 = vpop.permute.xlu1 %833 }
0x101f   :  { %v836_v53 = vmul.f32 %v1769_v33, %v834_v52  ;;  %v806_v54 = vpop.permute.xlu0 %805 }
0x1020   :  { %v808_v21 = vmul.f32 %v1771_v35, %v806_v54 }
0x1021   :  { %838 = vrot.lane.b32.xlu0 %v836_v53, %s1872_s0 }
0x1022   :  { %842 = vrot.lane.b32.xlu1 %v808_v21, %s1871_s1 }
0x1093   :  { %v839_v55 = vpop.permute.xlu0 %838 }
0x1094   :  { %v843_v56 = vpop.permute.xlu1 %842 }
0x1095   :  { %v845_v57 = vsel %vm168_vm1, %v839_v55, %v843_v56 }
0x1096   :  { %1484 = vmatmul.mubr.msk.f32.vlgmr.msra.gmra.mrb[6].mxu0 %vm170_vm2, %v845_v57 }
0x1097   :  { %1654 = vmatpush1.bf16.msra.mxu0 %v1923_v25  ;;  %1183 = vmatprep.mubr.f32.mxu0 %v1873_v43 }
0x1098   :  { %1656 = vmatprep.subr.bf16.mxu0 %v1925_v26 }
0x109b   :  { %1658 = vmatpush1.bf16.msra.mxu0 %v1930_v31 }
0x109c   :  { %1660 = vmatprep.subr.bf16.mxu0 %v1934_v32 }
0x109f   :  { %1662 = vmatpush1.bf16.msra.mxu0 %v1938_v37 }
0x10a0   :  { %1664 = vmatprep.subr.bf16.mxu0 %v1942_v38 }
0x10a3   :  { %1666 = vmatpush1.bf16.msra.mxu0 %v1947_v42 }
0x1169   :  { %v915_v59 = vpop.f32.mrb[6].mxu0 }
0x116a   :  { %v947_v60 = vadd.f32 %v945_v58, %v915_v59  ;;  %v917_v61 = vpop.f32.mrb[7].mxu0 }
0x116b   :  { %v920_v25 = vadd.f32 %v917_v61, %v1971_v49 }
0x116c   :  { %1776 = vtanh.f32 %v947_v60  ;;  %v1486_v31 = vmul.f32 -1.442695, %v947_v60 }
0x116d   :  { %1778 = vtanh.f32 %v920_v25  ;;  %v1485_v32 = vmul.f32 -1.442695, %v920_v25 }
0x116e   :  { %1780 = vpow2.f32 %v1486_v31 }
0x116f   :  { %1782 = vpow2.f32 %v1485_v32 }
0x1176   :  { %v1777_v26 = vpop.eup %1776 }
0x1177   :  { %v1779_v62 = vpop.eup %1778  ;;  %957 = vrot.lane.b32.xlu1 %v1777_v26, %s1871_s1 }
0x1178   :  { %930 = vrot.lane.b32.xlu0 %v1779_v62, %s1871_s1  ;;  %v1781_v37 = vpop.eup %1780 }
0x1179   :  { %v1783_v38 = vpop.eup %1782  ;;  %v951_v42 = vadd.f32 1.0, %v1781_v37 }
0x117a   :  { %v924_v63 = vadd.f32 1.0, %v1783_v38 }
0x117b   :  { %1784 = vrcp.f32 %v951_v42 }
0x117c   :  { %1786 = vrcp.f32 %v924_v63 }
0x1185   :  { %v1785_v0 = vpop.eup %1784 }
0x1186   :  { %v1787_v2 = vpop.eup %1786  ;;  %v955_v8 = vmul.f32 %v1785_v0, %v830_v46 }
0x1187   :  { %v928_v10 = vmul.f32 %v1787_v2, %v802_v48 }
0x11e9   :  { %v958_v1 = vpop.permute.xlu1 %957 }
0x11ea   :  { %v960_v3 = vmul.f32 %v1785_v0, %v958_v1  ;;  %v931_v4 = vpop.permute.xlu0 %930 }
0x11eb   :  { %v933_v6 = vmul.f32 %v1787_v2, %v931_v4 }
0x11ec   :  { %962 = vrot.lane.b32.xlu1 %v960_v3, %s1872_s0 }
0x11ed   :  { %935 = vrot.lane.b32.xlu0 %v933_v6, %s1872_s0 }
0x125e   :  { %v963_v9 = vpop.permute.xlu1 %962 }
0x125f   :  { %v965_v11 = vadd.f32 %v963_v9, %v955_v8  ;;  %v936_v12 = vpop.permute.xlu0 %935  ;;  %v45_v8 = vld [vmem:[#allocation2 + $0xa0] sm:$0xff] }
0x1260   :  { %v938_v13 = vadd.f32 %v936_v12, %v928_v10  ;;  %v47_v9 = vld [vmem:[#allocation2 + $0xc0] sm:$0xff]  ;;  %v1874_v10 = vmov 0.0|0.0   ;;  %v48_v12 = vld [vmem:[#allocation2 + $0xd0] sm:$0xff] }
0x1261   :  { %1788 = vtanh.f32 %v965_v11  ;;  %1667 = vmatprep.subr.bf16.mxu1 %v1874_v10  ;;  %1673 = vmatprep.subr.bf16.mxu0 %v1874_v10 }
0x1262   :  { %1790 = vtanh.f32 %v938_v13 }
0x126b   :  { %v1789_v7 = vpop.eup %1788 }
0x126c   :  { %v1791_v14 = vpop.eup %1790  ;;  %968 = vrot.lane.b32.xlu1 %v1789_v7, %s1871_s1 }
0x126d   :  { %941 = vrot.lane.b32.xlu0 %v1791_v14, %s1871_s1 }
0x12de   :  { %v969_v15 = vpop.permute.xlu1 %968 }
0x12df   :  { %v971_v16 = vmul.f32 %v1785_v0, %v969_v15  ;;  %v942_v18 = vpop.permute.xlu0 %941 }
0x12e0   :  { %v944_v17 = vmul.f32 %v1787_v2, %v942_v18  ;;  %v49_v18 = vld [vmem:[#allocation2 + $0xe0] sm:$0xff] }
0x12e1   :  { %973 = vrot.lane.b32.xlu0 %v971_v16, %s1872_s0 }
0x12e2   :  { %977 = vrot.lane.b32.xlu1 %v944_v17, %s1871_s1  ;;  %v50_v17 = vld [vmem:[#allocation2 + $0xf0] sm:$0xff] }
0x1353   :  { %v974_v19 = vpop.permute.xlu0 %973 }
0x1354   :  { %v978_v20 = vpop.permute.xlu1 %977 }
0x1355   :  { %v980_v22 = vsel %vm168_vm1, %v974_v19, %v978_v20  ;;  %v1674_v19 = vpack.c.bf16 %v50_v17, %v49_v18  ;;  %v53_v20 = vld [vmem:[#allocation2 + $0x120] ss:$0 sm:$0xff] }
0x1356   :  { %1487 = vmatmul.mubr.msk.f32.vlgmr.msra.gmra.mrb[6].mxu1 %vm170_vm2, %v980_v22 }
0x1357   :  { %1522 = vmatprep.mubr.msk.f32.mxu1 %vm1875_vm3, %v1873_v43 }
0x1429   :  { %v1050_v24 = vpop.f32.mrb[6].mxu1 }
0x142a   :  { %v1082_v27 = vadd.f32 %v1080_v23, %v1050_v24  ;;  %v1052_v28 = vpop.f32.mrb[7].mxu1 }
0x142b   :  { %v1055_v29 = vadd.f32 %v1052_v28, %v1971_v49  ;;  %v51_v28 = vld [vmem:[#allocation2 + $0x100] sm:$0xff] }
0x142c   :  { %1792 = vtanh.f32 %v1082_v27  ;;  %v1489_v34 = vmul.f32 -1.442695, %v1082_v27 }
0x142d   :  { %1794 = vtanh.f32 %v1055_v29  ;;  %v1488_v35 = vmul.f32 -1.442695, %v1055_v29  ;;  %v52_v29 = vld [vmem:[#allocation2 + $0x110] sm:$0xff] }
0x142e   :  { %1796 = vpow2.f32 %v1489_v34 }
0x142f   :  { %1798 = vpow2.f32 %v1488_v35 }
0x1436   :  { %v1793_v30 = vpop.eup %1792 }
0x1437   :  { %v1795_v33 = vpop.eup %1794  ;;  %1092 = vrot.lane.b32.xlu1 %v1793_v30, %s1871_s1  ;;  %v1677_v30 = vpack.c.bf16 %v52_v29, %v51_v28 }
0x1438   :  { %1065 = vrot.lane.b32.xlu0 %v1795_v33, %s1871_s1  ;;  %v1797_v36 = vpop.eup %1796  ;;  %v54_v33 = vld [vmem:[#allocation2 + $0x121] ss:$0 sm:$0xff] }
0x1439   :  { %v1799_v39 = vpop.eup %1798  ;;  %v1086_v5 = vadd.f32 1.0, %v1797_v36 }
0x143a   :  { %v1059_v40 = vadd.f32 1.0, %v1799_v39 }
0x143b   :  { %1800 = vrcp.f32 %v1086_v5  ;;  %v55_v5 = vld [vmem:[#allocation2 + $0x122] ss:$0 sm:$0xff] }
0x143c   :  { %1802 = vrcp.f32 %v1059_v40 }
0x1445   :  { %v1801_v41 = vpop.eup %1800 }
0x1446   :  { %v1803_v45 = vpop.eup %1802  ;;  %v1090_v50 = vmul.f32 %v1801_v41, %v965_v11 }
0x1447   :  { %v1063_v52 = vmul.f32 %v1803_v45, %v938_v13  ;;  %v1671_v13 = vpack.c.bf16 %v48_v12, %v47_v9 }
0x14a9   :  { %v1093_v44 = vpop.permute.xlu1 %1092 }
0x14aa   :  { %v1095_v46 = vmul.f32 %v1801_v41, %v1093_v44  ;;  %v1066_v47 = vpop.permute.xlu0 %1065 }
0x14ab   :  { %v1068_v48 = vmul.f32 %v1803_v45, %v1066_v47 }
0x14ac   :  { %1097 = vrot.lane.b32.xlu1 %v1095_v46, %s1872_s0 }
0x14ad   :  { %1070 = vrot.lane.b32.xlu0 %v1068_v48, %s1872_s0 }
0x151e   :  { %v1098_v51 = vpop.permute.xlu1 %1097 }
0x151f   :  { %v1100_v53 = vadd.f32 %v1098_v51, %v1090_v50  ;;  %v1071_v54 = vpop.permute.xlu0 %1070 }
0x1520   :  { %v1073_v21 = vadd.f32 %v1071_v54, %v1063_v52 }
0x1521   :  { %1804 = vtanh.f32 %v1100_v53 }
0x1522   :  { %1806 = vtanh.f32 %v1073_v21 }
0x152b   :  { %v1805_v55 = vpop.eup %1804 }
0x152c   :  { %v1807_v56 = vpop.eup %1806  ;;  %1103 = vrot.lane.b32.xlu1 %v1805_v55, %s1871_s1 }
0x152d   :  { %1076 = vrot.lane.b32.xlu0 %v1807_v56, %s1871_s1 }
0x159e   :  { %v1104_v57 = vpop.permute.xlu1 %1103 }
0x159f   :  { %v1106_v58 = vmul.f32 %v1801_v41, %v1104_v57  ;;  %v1077_v59 = vpop.permute.xlu0 %1076 }
0x15a0   :  { %v1079_v60 = vmul.f32 %v1803_v45, %v1077_v59 }
0x15a1   :  { %1108 = vrot.lane.b32.xlu0 %v1106_v58, %s1872_s0 }
0x15a2   :  { %1112 = vrot.lane.b32.xlu1 %v1079_v60, %s1871_s1 }
0x1613   :  { %v1109_v61 = vpop.permute.xlu0 %1108 }
0x1614   :  { %v1113_v25 = vpop.permute.xlu1 %1112 }
0x1615   :  { %v1115_v26 = vsel %vm168_vm1, %v1109_v61, %v1113_v25 }
0x1616   :  { %1490 = vmatmul.mubr.msk.f32.vlgmr.msra.gmra.mrb[8].mxu0 %vm170_vm2, %v1115_v26 }
0x1617   :  { %1529 = vmatprep.mubr.msk.f32.mxu0 %vm1875_vm3, %v1873_v43  ;;  %1675 = vmatpush3.bf16.msra.mxu0 %v1674_v19 }
0x1618   :  { %1676 = vmatprep.subr.bf16.mxu0 %v1874_v10 }
0x16e9   :  { %v1185_v62 = vpop.f32.mrb[8].mxu0 }
0x16ea   :  { %v1186_v31 = vpop.f32.mrb[9].mxu0 }
0x16eb   :  { %v1189_v32 = vadd.f32 %v1186_v31, %v1971_v49  ;;  %v46_v49 = vld [vmem:[#allocation2 + $0xb0] sm:$0xff] }
0x16ec   :  { %v1668_v11 = vpack.c.bf16 %v46_v49, %v45_v8 }
0x16ed   :  { %1808 = vtanh.f32 %v1189_v32  ;;  %v1491_v38 = vmul.f32 -1.442695, %v1189_v32 }
0x16ee   :  { %1669 = vmatpush3.bf16.msra.mxu1 %v1668_v11 }
0x16ef   :  { %1810 = vpow2.f32 %v1491_v38  ;;  %1670 = vmatprep.subr.bf16.mxu1 %v1874_v10 }
0x16f2   :  { %1672 = vmatpush3.bf16.msra.mxu1 %v1671_v13 }
0x16f7   :  { %v1809_v37 = vpop.eup %1808 }
0x16f8   :  { %1199 = vrot.lane.b32.xlu0 %v1809_v37, %s1871_s1 }
0x16f9   :  { %v1811_v42 = vpop.eup %1810 }
0x16fa   :  { %v1193_v63 = vadd.f32 1.0, %v1811_v42 }
0x16fc   :  { %1812 = vrcp.f32 %v1193_v63 }
0x1706   :  { %v1813_v0 = vpop.eup %1812 }
0x1707   :  { %v1197_v3 = vmul.f32 %v1813_v0, %v1073_v21 }
0x176a   :  { %v1200_v1 = vpop.permute.xlu0 %1199 }
0x176b   :  { %v1202_v2 = vmul.f32 %v1813_v0, %v1200_v1 }
0x176d   :  { %1204 = vrot.lane.b32.xlu1 %v1202_v2, %s1872_s0 }
0x17df   :  { %v1205_v4 = vpop.permute.xlu1 %1204 }
0x17e0   :  { %v1207_v6 = vadd.f32 %v1205_v4, %v1197_v3 }
0x17e2   :  { %1814 = vtanh.f32 %v1207_v6 }
0x17ec   :  { %v1815_v7 = vpop.eup %1814 }
0x17ed   :  { %1210 = vrot.lane.b32.xlu0 %v1815_v7, %s1871_s1 }
0x185f   :  { %v1211_v14 = vpop.permute.xlu0 %1210 }
0x1860   :  { %v1213_v15 = vmul.f32 %v1813_v0, %v1211_v14 }
0x1862   :  { %1215 = vrot.lane.b32.xlu1 %v1213_v15, %s1872_s0 }
0x18d4   :  { %v1216_v16 = vpop.permute.xlu1 %1215 }
0x18d5   :  { %1523 = vmatmul.mubr.msk.f32.vlgmr.msra.gmra.mrb[8].mxu1 %vm168_vm1, %v1216_v16 }
0x19a8   :  { %v1285_v22 = vpop.f32.mrb[8].mxu1 }
0x19a9   :  { %v1286_v23 = vadd.f32 %v1285_v22, %v53_v20  ;;  %v1524_v24 = vpop.f32.mrb[9].mxu1 }
0x19ab   :  { %v1289_v27 = vmax.f32 %v1286_v23, 0.0 }
0x19ad   :  { %1530 = vmatmul.mubr.msk.f32.vlgmr.msra.gmra.mrb[10].mxu0 %vm1290_vm4, %v1289_v27 }
0x19ae   :  { %1536 = vmatprep.mubr.msk.f32.mxu0 %vm1875_vm3, %v1873_v43  ;;  %1678 = vmatpush3.bf16.msra.mxu0 %v1677_v30 }
0x1a80   :  { %v1360_v34 = vpop.f32.mrb[10].mxu0 }
0x1a81   :  { %v1361_v35 = vadd.f32 %v1360_v34, %v54_v33  ;;  %v1531_v36 = vpop.f32.mrb[11].mxu0 }
0x1a83   :  { %v1364_v39 = vmax.f32 %v1361_v35, 0.0 }
0x1a85   :  { %1537 = vmatmul.mubr.msk.f32.vlgmr.msra.gmra.mrb[12].mxu0 %vm1290_vm4, %v1364_v39 }
0x1b58   :  { %v1434_v40 = vpop.f32.mrb[12].mxu0 }
0x1b59   :  { %v1435_v41 = vadd.f32 %v1434_v40, %v55_v5  ;;  %v1538_v44 = vpop.f32.mrb[13].mxu0 }
0x1b5b   :  { %v1439_v45 = vsel %vm1438_vm5, %v1435_v41, -inf }
0x1b5c   :  { %1440 = vmax.xlane.f32.xlu0 %v1439_v45 }
0x1be9   :  { %v1441_v46 = vpop.xlane.xlu0 %1440 }
0x1bea   :  { %v1442_v43 = vsub.f32 %v1435_v41, %v1441_v46 }
0x1bec   :  { %v1443_v47 = vmul.f32 1.442695, %v1442_v43 }
0x1bee   :  { %1816 = vpow2.f32 %v1443_v47 }
0x1bf8   :  { %v1817_v48 = vpop.eup %1816 }
0x1bf9   :  { %v1445_v50 = vsel %vm1438_vm5, %v1817_v48, 0.0 }
0x1bfa   :  { %1446 = vadd.xlane.f32.xlu1 %v1445_v50 }
0x1c87   :  { %v1447_v51 = vpop.xlane.xlu1 %1446 }
0x1c88   :  { %1818 = vrcp.f32 %v1447_v51 }
0x1c92   :  { %v1819_v52 = vpop.eup %1818 }
0x1c93   :  { %v1449_v53 = vmul.f32 %v1819_v52, %v1817_v48 }
0x1c95   :  { %1450 = vst.msk [vmem:[#allocation5] sm:$0x3] %vm1438_vm5, %v1449_v53 }
0x1c96   :  { %1853 = shalt.err (!%p1850_p12)
}
0x1c97   :  { %s1854_s4 = scalar_lea.hbm %s2129_s2, 32 }
0x1c98   :  { %p1855_p13 = scmp.ne.s32.totalorder %s2129_s2, %s1854_s4  ;;  %p1858_p0 = scmp.lt.u32.totalorder %s1854_s4, %s2129_s2 }
0x1c9a   :  { %p1860_p1 = pnand %p1858_p0, %p1855_p13 }
0x1c9c   :  { %1863 = shalt.err (!%p1860_p1)
}
0x1c9d   :  { %1460 = dma.vmem_to_hbm [thread:$0]  %s1458_s28, 32, %s2129_s2, [#allocation4]  }
0x1c9e   :  { %1866 = dma.done.wait [#allocation4], 32  }
0x1c9f   :  { %1867 = vsyncadd [#allocation4], 4294967264 }
0x1ca0   :  { %1464 = vsyncpa [#allocation3], 1 }
0x1ca1   :  { %1465 = vsyncpa [#allocation4], 1 }

</bundles_post_ra>
